<compile_context>
chip_gen: v5e
topology: v5e:2x2
jax: 0.10.0
libtpu: 0.0.40
codegen_flags: <defaults>
</compile_context>

<pallas_src>
import numpy as np
import jax
import jax.numpy as jnp
from jax.experimental import pallas as pl
from jax.experimental.pallas import tpu as pltpu


# ----------------------------------------------------------------------------
# Parameter construction (deterministic, mirrors PositionalEncoding.__init__)
# ----------------------------------------------------------------------------
def make_position_encoding_table(d_model: int, max_seq_len: int) -> jnp.ndarray:
    """Builds the (max_seq_len + 1, d_model) table; row 0 is the zero pad row."""
    j = np.arange(d_model)
    pos = np.arange(max_seq_len)[:, None].astype(np.float64)
    angle = pos / np.power(10000.0, 2.0 * (j // 2) / d_model)
    pe = np.empty((max_seq_len, d_model), dtype=np.float64)
    pe[:, 0::2] = np.sin(angle[:, 0::2])
    pe[:, 1::2] = np.cos(angle[:, 1::2])
    pe = pe.astype(np.float32)
    pad_row = np.zeros((1, d_model), dtype=np.float32)
    return jnp.asarray(np.concatenate([pad_row, pe], axis=0))   # (max_seq_len + 1, d_model)


def _round_up(x: int, m: int) -> int:
    return ((x + m - 1) // m) * m


# ----------------------------------------------------------------------------
# Pallas kernel: masked broadcast of the contiguous table slice (pure VPU select)
# ----------------------------------------------------------------------------
def pe_mask_kernel(pos_ref, pe_ref, out_ref):
    # pos_ref: (TB, S_pad, 1)      int32   -- position ids, 0 == padding
    # pe_ref:  (S_pad, D_pad)      float32 -- table[1:], row s = encoding of position s+1
    # out_ref: (TB, S_pad, D_pad)  float32
    mask = pos_ref[...] > 0                  # (TB, S_pad, 1)  -> lane-broadcast in select
    pe = pe_ref[...][None, :, :]             # (1, S_pad, D_pad) leading-dim broadcast
    out_ref[...] = jnp.where(mask, pe, 0.0)


# ----------------------------------------------------------------------------
# Wrapper (glue): build padded position ids, call the kernel, strip padding
# ----------------------------------------------------------------------------
def positional_encoding_forward(input_len: jnp.ndarray, table: jnp.ndarray,
                                *, batch_tile: int = 8):
    """Mirrors PositionalEncoding.forward with a static-shape output.

    Returns (position_encoding_output, input_pos):
      position_encoding_output: (B, max_seq_len, d_model) float32
      input_pos:                (B, max_seq_len) int32
    Columns beyond max(input_len) hold position id 0 -> zero encoding row, i.e. the
    result equals the PyTorch output zero-padded to the static max_seq_len.
    """
    input_len = jnp.asarray(input_len).reshape(-1).astype(jnp.int32)   # accept (B,) or (B,1)
    batch = input_len.shape[0]
    v, d_model = table.shape
    seq = v - 1                                                        # static max_seq_len

    # input_pos[b, t] = t+1 if t < input_len[b] else 0   (same as the PyTorch loop)
    positions = jnp.arange(1, seq + 1, dtype=jnp.int32)                # (S,)
    input_pos = jnp.where(positions[None, :] <= input_len[:, None],
                          positions[None, :], 0).astype(jnp.int32)     # (B, S)

    # Pad to TPU-friendly shapes.
    tb = batch_tile
    b_pad = _round_up(batch, tb)
    s_pad = _round_up(seq, 8)
    d_pad = _round_up(d_model, 128)

    pe = table[1:, :]                                                  # (S, d_model)
    pe_pad = jnp.pad(pe, ((0, s_pad - seq), (0, d_pad - d_model)))     # (S_pad, D_pad)
    pos_pad = jnp.pad(input_pos[:, :, None],
                      ((0, b_pad - batch), (0, s_pad - seq), (0, 0)))  # (B_pad, S_pad, 1)

    out_pad = pl.pallas_call(
        pe_mask_kernel,
        out_shape=jax.ShapeDtypeStruct((b_pad, s_pad, d_pad), jnp.float32),
        grid_spec=pl.GridSpec(
            grid=(b_pad // tb,),
            in_specs=[
                pl.BlockSpec((tb, s_pad, 1), lambda b: (b, 0, 0)),     # position ids
                pl.BlockSpec((s_pad, d_pad), lambda b: (0, 0)),        # table[1:], resident
            ],
            out_specs=pl.BlockSpec((tb, s_pad, d_pad), lambda b: (b, 0, 0)),
        ),
        compiler_params=pltpu.CompilerParams(
            dimension_semantics=("parallel",),
            vmem_limit_bytes=32 * 1024 * 1024,
        ),
    )(pos_pad, pe_pad)

    out = out_pad[:batch, :seq, :d_model]
    return out, input_pos


# ----------------------------------------------------------------------------
# Demo / correctness check
# ----------------------------------------------------------------------------
if __name__ == "__main__":
    # Shapes used by TransformerTime's EncoderNew: model_dim=768, max_seq_len=51.
    d_model = 768
    max_seq_len = 51
    batch = 4

    table = make_position_encoding_table(d_model, max_seq_len)

    key = jax.random.PRNGKey(0)
    input_len = jax.random.randint(key, (batch,), 1, max_seq_len + 1).astype(jnp.int32)

    fwd = jax.jit(positional_encoding_forward)
    out, input_pos = fwd(input_len, table)
    out = jax.block_until_ready(out)
    input_pos = jax.block_until_ready(input_pos)

    # Reference: plain JAX embedding gather on the same padded position ids.
    ref = jnp.take(table, input_pos, axis=0)
    np.testing.assert_allclose(np.asarray(out), np.asarray(ref), rtol=1e-6, atol=1e-6)

    print("KERNEL_OK")
</pallas_src>

<mosaic_0001>
module attributes {stable_mosaic.version = 11 : i64} {
  func.func @pe_mask_kernel(%arg0: i32, %arg1: memref<8x56x1xi32, #tpu.memory_space<vmem>>, %arg2: memref<56x768xf32, #tpu.memory_space<vmem>>, %arg3: memref<8x56x768xf32, #tpu.memory_space<vmem>>) attributes {dimension_semantics = [#tpu.dimension_semantics<parallel>], iteration_bounds = array<i64: 1>, scalar_prefetch = 0 : i64, scratch_operands = 0 : i64, tpu.core_type = #tpu.core_type<tc>, window_params = [{transform_indices = @transform_0, window_bounds = array<i64: 8, 56, 1>}, {pipeline_mode = #tpu.pipeline_mode<synchronous>, transform_indices = @transform_1, window_bounds = array<i64: 56, 768>}, {transform_indices = @transform_2, window_bounds = array<i64: 8, 56, 768>}]} {
    %c0 = arith.constant 0 : index
    %c0_0 = arith.constant 0 : index
    %c0_1 = arith.constant 0 : index
    %0 = vector.load %arg1[%c0, %c0_0, %c0_1] : memref<8x56x1xi32, #tpu.memory_space<vmem>>, vector<8x56x1xi32>
    %c0_i32 = arith.constant 0 : i32
    %1 = vector.broadcast %c0_i32 : i32 to vector<8x56x1xi32>
    %2 = arith.cmpi sgt, %0, %1 : vector<8x56x1xi32>
    %c0_2 = arith.constant 0 : index
    %c0_3 = arith.constant 0 : index
    %3 = vector.load %arg2[%c0_2, %c0_3] : memref<56x768xf32, #tpu.memory_space<vmem>>, vector<56x768xf32>
    %4 = vector.shape_cast %3 : vector<56x768xf32> to vector<1x56x768xf32>
    %cst = arith.constant 0.000000e+00 : f32
    %5 = vector.shape_cast %2 : vector<8x56x1xi1> to vector<8x56x1xi1>
    %6 = vector.broadcast %5 : vector<8x56x1xi1> to vector<8x56x768xi1>
    %7 = vector.shape_cast %4 : vector<1x56x768xf32> to vector<1x56x768xf32>
    %8 = vector.broadcast %7 : vector<1x56x768xf32> to vector<8x56x768xf32>
    %9 = vector.broadcast %cst : f32 to vector<8x56x768xf32>
    %10 = arith.select %6, %8, %9 : vector<8x56x768xi1>, vector<8x56x768xf32>
    %c0_4 = arith.constant 0 : index
    %c0_5 = arith.constant 0 : index
    %c0_6 = arith.constant 0 : index
    %11 = vector.load %arg3[%c0_4, %c0_5, %c0_6] : memref<8x56x768xf32, #tpu.memory_space<vmem>>, vector<8x56x768xf32>
    tpu.vector_store %arg3[%c0_4, %c0_5, %c0_6], %10 {strides = array<i32>} : memref<8x56x768xf32, #tpu.memory_space<vmem>>, vector<8x56x768xf32>,
    return
  }
  func.func @transform_0(%arg0: i32) -> (i32, i32, i32) {
    %c0_i32 = arith.constant 0 : i32
    %c0_i32_0 = arith.constant 0 : i32
    %c0_i32_1 = arith.constant 0 : i32
    return %arg0, %c0_i32, %c0_i32_0 : i32, i32, i32
  }
  func.func @transform_1(%arg0: i32) -> (i32, i32) {
    %c0_i32 = arith.constant 0 : i32
    %c0_i32_0 = arith.constant 0 : i32
    %c0_i32_1 = arith.constant 0 : i32
    return %c0_i32, %c0_i32_0 : i32, i32
  }
  func.func @transform_2(%arg0: i32) -> (i32, i32, i32) {
    %c0_i32 = arith.constant 0 : i32
    %c0_i32_0 = arith.constant 0 : i32
    %c0_i32_1 = arith.constant 0 : i32
    return %arg0, %c0_i32, %c0_i32_0 : i32, i32, i32
  }
}

</mosaic_0001>

<bundles_post_ra>
// kernel: positional_encoding_forward.1
= control target key start
LH: loop header
LB: loop body
LE: loop exit
PB: predicated region body
PF: predicated region fallthrough
CT: control target
= control target key end

     0   :  { %v1167_v0 = vmov 0   ;;  %s3408_s0 = inlined_call_operand.vmem [shape: s32[8,56,1], index: 0, kind: input, shape index: {}]   ;;  %s3409_s1 = inlined_call_operand.vmem [shape: f32[56,768], index: 1, kind: input, shape index: {}]   ;;  %s3410_s2 = inlined_call_operand.vmem [shape: f32[8,56,768], index: 2, kind: output, shape index: {}]  }
   0x1   :  { %1124 = vset.pattern.permute.xlu2 %v1167_v0  ;;  %1123 = vset.pattern.permute.xlu1 %v1167_v0  ;;  %v15_v1 = vld [vmem:[%s3408_s0 + $0x20] sm:$0xff]  ;;  %v13_v2 = vld [vmem:[%s3408_s0 + $0x10] sm:$0xff]  ;;  %v16_v7 = vld [vmem:[%s3408_s0 + $0x28] sm:$0xff] }
   0x2   :  { %v11_v3 = vld [vmem:[%s3408_s0] sm:$0xff]  ;;  %1122 = vset.pattern.permute.xlu0 %v1167_v0  ;;  %vm71_vm0 = vcmp.gt.s32.totalorder %v15_v1, 0  ;;  %vm69_vm1 = vcmp.gt.s32.totalorder %v13_v2, 0  ;;  %v14_v8 = vld [vmem:[%s3408_s0 + $0x18] sm:$0xff]  ;;  %v12_v9 = vld [vmem:[%s3408_s0 + $0x8] sm:$0xff]  ;;  %vm72_vm3 = vcmp.gt.s32.totalorder %v16_v7, 0 }
   0x3   :  { %vm67_vm2 = vcmp.gt.s32.totalorder %v11_v3, 0  ;;  %v169_v4 = vsel %vm71_vm0, 1, %v1167_v0  ;;  %v167_v5 = vsel %vm69_vm1, 1, %v1167_v0  ;;  %vm70_vm4 = vcmp.gt.s32.totalorder %v14_v8, 0  ;;  %v19_v13 = vld [vmem:[%s3408_s0 + $0x40] sm:$0xff]  ;;  %v18_v14 = vld [vmem:[%s3408_s0 + $0x38] sm:$0xff] }
   0x4   :  { %v165_v6 = vsel %vm67_vm2, 1, %v1167_v0  ;;  %234 = vperm.xlu2 %1124, %v169_v4   ;;  %228 = vperm.xlu1 %1123, %v167_v5   ;;  %vm68_vm5 = vcmp.gt.s32.totalorder %v12_v9, 0  ;;  %v170_v10 = vsel %vm72_vm3, 1, %v1167_v0  ;;  %v168_v11 = vsel %vm70_vm4, 1, %v1167_v0  ;;  %v17_v15 = vld [vmem:[%s3408_s0 + $0x30] sm:$0xff]  ;;  %v22_v19 = vld [vmem:[%s3408_s0 + $0x58] sm:$0xff] }
   0x5   :  { %222 = vperm.xlu0 %1122, %v165_v6   ;;  %v166_v12 = vsel %vm68_vm5, 1, %v1167_v0  ;;  %vm75_vm6 = vcmp.gt.s32.totalorder %v19_v13, 0  ;;  %vm74_vm7 = vcmp.gt.s32.totalorder %v18_v14, 0  ;;  %vm73_vm8 = vcmp.gt.s32.totalorder %v17_v15, 0  ;;  %v21_v20 = vld [vmem:[%s3408_s0 + $0x50] sm:$0xff]  ;;  %v20_v21 = vld [vmem:[%s3408_s0 + $0x48] sm:$0xff] }
   0x6   :  { %v173_v16 = vsel %vm75_vm6, 1, %v1167_v0  ;;  %v172_v17 = vsel %vm74_vm7, 1, %v1167_v0  ;;  %v171_v18 = vsel %vm73_vm8, 1, %v1167_v0  ;;  %vm78_vm9 = vcmp.gt.s32.totalorder %v22_v19, 0  ;;  %v25_v25 = vld [vmem:[%s3408_s0 + $0x70] sm:$0xff]  ;;  %v24_v26 = vld [vmem:[%s3408_s0 + $0x68] sm:$0xff] }
   0x7   :  { %vm77_vm10 = vcmp.gt.s32.totalorder %v21_v20, 0  ;;  %vm76_vm11 = vcmp.gt.s32.totalorder %v20_v21, 0  ;;  %v176_v22 = vsel %vm78_vm9, 1, %v1167_v0  ;;  %v23_v27 = vld [vmem:[%s3408_s0 + $0x60] sm:$0xff]  ;;  %vm81_vm12 = vcmp.gt.s32.totalorder %v25_v25, 0  ;;  %v28_v31 = vld [vmem:[%s3408_s0 + $0x88] sm:$0xff] }
   0x8   :  { %v175_v23 = vsel %vm77_vm10, 1, %v1167_v0  ;;  %v174_v24 = vsel %vm76_vm11, 1, %v1167_v0  ;;  %vm80_vm13 = vcmp.gt.s32.totalorder %v24_v26, 0  ;;  %vm79_vm14 = vcmp.gt.s32.totalorder %v23_v27, 0  ;;  %v27_v32 = vld [vmem:[%s3408_s0 + $0x80] sm:$0xff]  ;;  %v26_v33 = vld [vmem:[%s3408_s0 + $0x78] sm:$0xff] }
   0x9   :  { %v179_v28 = vsel %vm81_vm12, 1, %v1167_v0  ;;  %v178_v29 = vsel %vm80_vm13, 1, %v1167_v0  ;;  %v177_v30 = vsel %vm79_vm14, 1, %v1167_v0  ;;  %vm84_vm15 = vcmp.gt.s32.totalorder %v28_v31, 0  ;;  %v31_v37 = vld [vmem:[%s3408_s0 + $0xa0] sm:$0xff]  ;;  %v30_v38 = vld [vmem:[%s3408_s0 + $0x98] sm:$0xff] }
   0xa   :  { %vm83_vm0 = vcmp.gt.s32.totalorder %v27_v32, 0  ;;  %vm82_vm1 = vcmp.gt.s32.totalorder %v26_v33, 0  ;;  %v182_v34 = vsel %vm84_vm15, 1, %v1167_v0  ;;  %v29_v39 = vld [vmem:[%s3408_s0 + $0x90] sm:$0xff]  ;;  %vm87_vm2 = vcmp.gt.s32.totalorder %v31_v37, 0  ;;  %v34_v43 = vld [vmem:[%s3408_s0 + $0xb8] sm:$0xff] }
   0xb   :  { %v181_v35 = vsel %vm83_vm0, 1, %v1167_v0  ;;  %v180_v36 = vsel %vm82_vm1, 1, %v1167_v0  ;;  %vm86_vm3 = vcmp.gt.s32.totalorder %v30_v38, 0  ;;  %vm85_vm4 = vcmp.gt.s32.totalorder %v29_v39, 0  ;;  %v33_v44 = vld [vmem:[%s3408_s0 + $0xb0] sm:$0xff]  ;;  %v32_v45 = vld [vmem:[%s3408_s0 + $0xa8] sm:$0xff] }
   0xc   :  { %237 = vperm.xlu2 %1124, %v170_v10   ;;  %231 = vperm.xlu1 %1123, %v168_v11   ;;  %v185_v40 = vsel %vm87_vm2, 1, %v1167_v0  ;;  %v184_v41 = vsel %vm86_vm3, 1, %v1167_v0  ;;  %v183_v42 = vsel %vm85_vm4, 1, %v1167_v0  ;;  %vm90_vm5 = vcmp.gt.s32.totalorder %v34_v43, 0  ;;  %v37_v49 = vld [vmem:[%s3408_s0 + $0xd0] sm:$0xff]  ;;  %v36_v50 = vld [vmem:[%s3408_s0 + $0xc8] sm:$0xff] }
   0xd   :  { %225 = vperm.xlu0 %1122, %v166_v12   ;;  %vm89_vm6 = vcmp.gt.s32.totalorder %v33_v44, 0  ;;  %vm88_vm7 = vcmp.gt.s32.totalorder %v32_v45, 0  ;;  %v188_v46 = vsel %vm90_vm5, 1, %v1167_v0  ;;  %v35_v51 = vld [vmem:[%s3408_s0 + $0xc0] sm:$0xff]  ;;  %vm93_vm8 = vcmp.gt.s32.totalorder %v37_v49, 0  ;;  %v40_v55 = vld [vmem:[%s3408_s0 + $0xe8] sm:$0xff] }
   0xe   :  { %v187_v47 = vsel %vm89_vm6, 1, %v1167_v0  ;;  %v186_v48 = vsel %vm88_vm7, 1, %v1167_v0  ;;  %vm92_vm9 = vcmp.gt.s32.totalorder %v36_v50, 0  ;;  %vm91_vm10 = vcmp.gt.s32.totalorder %v35_v51, 0  ;;  %v39_v56 = vld [vmem:[%s3408_s0 + $0xe0] sm:$0xff]  ;;  %v38_v57 = vld [vmem:[%s3408_s0 + $0xd8] sm:$0xff] }
   0xf   :  { %v191_v52 = vsel %vm93_vm8, 1, %v1167_v0  ;;  %v190_v53 = vsel %vm92_vm9, 1, %v1167_v0  ;;  %v189_v54 = vsel %vm91_vm10, 1, %v1167_v0  ;;  %vm96_vm11 = vcmp.gt.s32.totalorder %v40_v55, 0  ;;  %v43_v61 = vld [vmem:[%s3408_s0 + $0x100] sm:$0xff]  ;;  %v42_v62 = vld [vmem:[%s3408_s0 + $0xf8] sm:$0xff] }
  0x10   :  { %vm95_vm12 = vcmp.gt.s32.totalorder %v39_v56, 0  ;;  %vm94_vm13 = vcmp.gt.s32.totalorder %v38_v57, 0  ;;  %v194_v58 = vsel %vm96_vm11, 1, %v1167_v0  ;;  %v41_v63 = vld [vmem:[%s3408_s0 + $0xf0] sm:$0xff]  ;;  %vm99_vm14 = vcmp.gt.s32.totalorder %v43_v61, 0  ;;  %v46_v4 = vld [vmem:[%s3408_s0 + $0x118] sm:$0xff] }
  0x11   :  { %v193_v59 = vsel %vm95_vm12, 1, %v1167_v0  ;;  %v192_v60 = vsel %vm94_vm13, 1, %v1167_v0  ;;  %vm98_vm15 = vcmp.gt.s32.totalorder %v42_v62, 0  ;;  %vm97_vm0 = vcmp.gt.s32.totalorder %v41_v63, 0  ;;  %v45_v5 = vld [vmem:[%s3408_s0 + $0x110] sm:$0xff]  ;;  %v44_v6 = vld [vmem:[%s3408_s0 + $0x108] sm:$0xff] }
  0x12   :  { %v197_v1 = vsel %vm99_vm14, 1, %v1167_v0  ;;  %v196_v2 = vsel %vm98_vm15, 1, %v1167_v0  ;;  %v195_v3 = vsel %vm97_vm0, 1, %v1167_v0  ;;  %vm102_vm1 = vcmp.gt.s32.totalorder %v46_v4, 0  ;;  %v49_v10 = vld [vmem:[%s3408_s0 + $0x130] sm:$0xff]  ;;  %v48_v11 = vld [vmem:[%s3408_s0 + $0x128] sm:$0xff] }
  0x13   :  { %vm101_vm2 = vcmp.gt.s32.totalorder %v45_v5, 0  ;;  %vm100_vm3 = vcmp.gt.s32.totalorder %v44_v6, 0  ;;  %v200_v7 = vsel %vm102_vm1, 1, %v1167_v0  ;;  %v47_v12 = vld [vmem:[%s3408_s0 + $0x120] sm:$0xff]  ;;  %v1347_v14 = vld [vmem:[%s3409_s1 + $0xc8] sm:$0xff]  ;;  %v1352_v15 = vld [vmem:[%s3409_s1 + $0xd0] sm:$0xff] }
  0x14   :  { %246 = vperm.xlu2 %1124, %v173_v16   ;;  %243 = vperm.xlu1 %1123, %v172_v17   ;;  %v199_v8 = vsel %vm101_vm2, 1, %v1167_v0  ;;  %v198_v9 = vsel %vm100_vm3, 1, %v1167_v0  ;;  %v1342_v13 = vld [vmem:[%s3409_s1 + $0xc0] sm:$0xff]  ;;  %v1357_v16 = vld [vmem:[%s3409_s1 + $0xd8] sm:$0xff]  ;;  %vm105_vm4 = vcmp.gt.s32.totalorder %v49_v10, 0  ;;  %vm104_vm5 = vcmp.gt.s32.totalorder %v48_v11, 0 }
  0x15   :  { %240 = vperm.xlu0 %1122, %v171_v18   ;;  %v1362_v18 = vld [vmem:[%s3409_s1 + $0xe0] sm:$0xff]  ;;  %vm103_vm7 = vcmp.gt.s32.totalorder %v47_v12, 0  ;;  %v1367_v19 = vld [vmem:[%s3409_s1 + $0xe8] sm:$0xff]  ;;  %v202_v25 = vsel %vm104_vm5, 1, %v1167_v0  ;;  %v50_v31 = vld [vmem:[%s3408_s0 + $0x138] sm:$0xff] }
  0x16   :  { %v201_v27 = vsel %vm103_vm7, 1, %v1167_v0  ;;  %v1405_v32 = vld [vmem:[%s3409_s1 + $0xf0] sm:$0xff]  ;;  %v1410_v33 = vld [vmem:[%s3409_s1 + $0xf8] sm:$0xff]  ;;  %vm106_vm11 = vcmp.gt.s32.totalorder %v50_v31, 0  ;;  %v56_v6 = vld [vmem:[%s3408_s0 + $0x168] sm:$0xff] }
  0x17   :  { %v1428_v37 = vld [vmem:[%s3409_s1 + $0x110] sm:$0xff]  ;;  %v1433_v38 = vld [vmem:[%s3409_s1 + $0x118] sm:$0xff]  ;;  %vm112_vm3 = vcmp.gt.s32.totalorder %v56_v6, 0  ;;  %v1589_v31 = vld [vmem:[%s3409_s1 + $0x80] sm:$0xff] }
  0x18   :  { %v54_v49 = vld [vmem:[%s3408_s0 + $0x158] sm:$0xff]  ;;  %v53_v50 = vld [vmem:[%s3408_s0 + $0x150] sm:$0xff] }
  0x19   :  { %v1471_v51 = vld [vmem:[%s3409_s1 + $0x30] sm:$0xff]  ;;  %vm110_vm13 = vcmp.gt.s32.totalorder %v54_v49, 0  ;;  %vm109_vm15 = vcmp.gt.s32.totalorder %v53_v50, 0  ;;  %v1499_v57 = vld [vmem:[%s3409_s1 + $0x58] sm:$0xff] }
  0x1a   :  { %v1494_v56 = vld [vmem:[%s3409_s1 + $0x50] sm:$0xff]  ;;  %v208_v63 = vsel %vm110_vm13, 1, %v1167_v0  ;;  %v58_v4 = vld [vmem:[%s3408_s0 + $0x178] sm:$0xff] }
  0x1b   :  { %v57_v5 = vld [vmem:[%s3408_s0 + $0x170] sm:$0xff]  ;;  %vm114_vm0 = vcmp.gt.s32.totalorder %v58_v4, 0 }
  0x1c   :  { %255 = vperm.xlu2 %1124, %v176_v22   ;;  %252 = vperm.xlu1 %1123, %v175_v23   ;;  %vm113_vm1 = vcmp.gt.s32.totalorder %v57_v5, 0 }
  0x1d   :  { %249 = vperm.xlu0 %1122, %v174_v24   ;;  %v203_v24 = vsel %vm105_vm4, 1, %v1167_v0 }
  0x24   :  { %264 = vperm.xlu2 %1124, %v179_v28   ;;  %261 = vperm.xlu1 %1123, %v178_v29   ;;  %v52_v29 = vld [vmem:[%s3408_s0 + $0x148] sm:$0xff] }
  0x25   :  { %258 = vperm.xlu0 %1122, %v177_v30   ;;  %v51_v30 = vld [vmem:[%s3408_s0 + $0x140] sm:$0xff]  ;;  %vm108_vm8 = vcmp.gt.s32.totalorder %v52_v29, 0 }
  0x26   :  { %vm107_vm9 = vcmp.gt.s32.totalorder %v51_v30, 0  ;;  %v206_v43 = vsel %vm108_vm8, 1, %v1167_v0  ;;  %v61_v30 = vld [vmem:[%s3408_s0 + $0x190] sm:$0xff] }
  0x27   :  { %v205_v44 = vsel %vm107_vm9, 1, %v1167_v0  ;;  %vm117_vm5 = vcmp.gt.s32.totalorder %v61_v30, 0  ;;  %v62_v30 = vld [vmem:[%s3408_s0 + $0x198] sm:$0xff] }
  0x28   :  { %v215_v49 = vsel %vm117_vm5, 1, %v1167_v0  ;;  %vm118_vm13 = vcmp.gt.s32.totalorder %v62_v30, 0 }
  0x2c   :  { %273 = vperm.xlu2 %1124, %v182_v34   ;;  %270 = vperm.xlu1 %1123, %v181_v35   ;;  %v1415_v34 = vld [vmem:[%s3409_s1 + $0x100] sm:$0xff]  ;;  %v1423_v35 = vld [vmem:[%s3409_s1 + $0x108] sm:$0xff] }
  0x2d   :  { %267 = vperm.xlu0 %1122, %v180_v36  }
  0x34   :  { %282 = vperm.xlu2 %1124, %v185_v40   ;;  %279 = vperm.xlu1 %1123, %v184_v41  }
  0x35   :  { %276 = vperm.xlu0 %1122, %v183_v42  }
  0x3c   :  { %291 = vperm.xlu2 %1124, %v188_v46   ;;  %288 = vperm.xlu1 %1123, %v187_v47   ;;  %v204_v46 = vsel %vm106_vm11, 1, %v1167_v0 }
  0x3d   :  { %285 = vperm.xlu0 %1122, %v186_v48   ;;  %v55_v48 = vld [vmem:[%s3408_s0 + $0x160] sm:$0xff] }
  0x3e   :  { %vm111_vm12 = vcmp.gt.s32.totalorder %v55_v48, 0  ;;  %v1637_v48 = vld [vmem:[%s3409_s1 + $0x10] sm:$0xff] }
  0x3f   :  { %v209_v62 = vsel %vm111_vm12, 1, %v1167_v0 }
  0x44   :  { %300 = vperm.xlu2 %1124, %v191_v52   ;;  %297 = vperm.xlu1 %1123, %v190_v53   ;;  %v1476_v52 = vld [vmem:[%s3409_s1 + $0x38] sm:$0xff]  ;;  %v1481_v53 = vld [vmem:[%s3409_s1 + $0x40] sm:$0xff] }
  0x45   :  { %294 = vperm.xlu0 %1122, %v189_v54   ;;  %v1489_v54 = vld [vmem:[%s3409_s1 + $0x48] sm:$0xff] }
  0x4c   :  { %309 = vperm.xlu2 %1124, %v194_v58   ;;  %306 = vperm.xlu1 %1123, %v193_v59  }
  0x4d   :  { %303 = vperm.xlu0 %1122, %v192_v60  }
  0x54   :  { %318 = vperm.xlu2 %1124, %v197_v1   ;;  %315 = vperm.xlu1 %1123, %v196_v2   ;;  %v207_v2 = vsel %vm109_vm15, 1, %v1167_v0 }
  0x55   :  { %312 = vperm.xlu0 %1122, %v195_v3  }
  0x5c   :  { %327 = vperm.xlu2 %1124, %v200_v7   ;;  %324 = vperm.xlu1 %1123, %v199_v8  }
  0x5d   :  { %321 = vperm.xlu0 %1122, %v198_v9  }
  0x5e   :  { %v235_v17 = vpop.permute.xlu2 %234 }
  0x5f   :  { %vm393_vm6 = vcmp.eq.s32.totalorder %v235_v17, 1  ;;  %v1547_v17 = vld [vmem:[%s3409_s1 + $0x60] sm:$0xff] }
  0x60   :  { %v469_v20 = vsel %vm393_vm6, %v1342_v13, 0.0  ;;  %v470_v21 = vsel %vm393_vm6, %v1347_v14, 0.0  ;;  %v471_v22 = vsel %vm393_vm6, %v1352_v15, 0.0  ;;  %v472_v23 = vsel %vm393_vm6, %v1357_v16, 0.0 }
  0x61   :  { %805 = vst [vmem:[%s3410_s2 + $0xc0] sm:$0xff] %v469_v20  ;;  %v473_v26 = vsel %vm393_vm6, %v1362_v18, 0.0  ;;  %v474_v28 = vsel %vm393_vm6, %v1367_v19, 0.0  ;;  %v212_v20 = vsel %vm114_vm0, 1, %v1167_v0 }
  0x62   :  { %806 = vst [vmem:[%s3410_s2 + $0xc8] sm:$0xff] %v470_v21  ;;  %v211_v21 = vsel %vm113_vm1, 1, %v1167_v0 }
  0x63   :  { %807 = vst [vmem:[%s3410_s2 + $0xd0] sm:$0xff] %v471_v22 }
  0x64   :  { %808 = vst [vmem:[%s3410_s2 + $0xd8] sm:$0xff] %v472_v23  ;;  %336 = vperm.xlu2 %1124, %v203_v24   ;;  %333 = vperm.xlu1 %1123, %v202_v25   ;;  %v1558_v23 = vld [vmem:[%s3409_s1 + $0x68] sm:$0xff]  ;;  %v210_v24 = vsel %vm112_vm3, 1, %v1167_v0 }
  0x65   :  { %809 = vst [vmem:[%s3410_s2 + $0xe0] sm:$0xff] %v473_v26  ;;  %330 = vperm.xlu0 %1122, %v201_v27   ;;  %v1568_v26 = vld [vmem:[%s3409_s1 + $0x70] sm:$0xff]  ;;  %v1576_v27 = vld [vmem:[%s3409_s1 + $0x78] sm:$0xff] }
  0x66   :  { %810 = vst [vmem:[%s3410_s2 + $0xe8] sm:$0xff] %v474_v28  ;;  %v238_v36 = vpop.permute.xlu2 %237 }
  0x67   :  { %vm394_vm10 = vcmp.eq.s32.totalorder %v238_v36, 1 }
  0x68   :  { %v475_v39 = vsel %vm394_vm10, %v1405_v32, 0.0  ;;  %v476_v40 = vsel %vm394_vm10, %v1410_v33, 0.0  ;;  %v477_v41 = vsel %vm394_vm10, %v1415_v34, 0.0  ;;  %v478_v42 = vsel %vm394_vm10, %v1423_v35, 0.0 }
  0x69   :  { %811 = vst [vmem:[%s3410_s2 + $0xf0] sm:$0xff] %v475_v39  ;;  %v479_v45 = vsel %vm394_vm10, %v1428_v37, 0.0  ;;  %v480_v47 = vsel %vm394_vm10, %v1433_v38, 0.0  ;;  %v60_v39 = vld [vmem:[%s3408_s0 + $0x188] sm:$0xff] }
  0x6a   :  { %812 = vst [vmem:[%s3410_s2 + $0xf8] sm:$0xff] %v476_v40  ;;  %v59_v40 = vld [vmem:[%s3408_s0 + $0x180] sm:$0xff]  ;;  %vm116_vm6 = vcmp.gt.s32.totalorder %v60_v39, 0 }
  0x6b   :  { %813 = vst [vmem:[%s3410_s2 + $0x100] sm:$0xff] %v477_v41  ;;  %v1605_v41 = vld [vmem:[%s3409_s1 + $0x88] sm:$0xff]  ;;  %vm115_vm8 = vcmp.gt.s32.totalorder %v59_v40, 0  ;;  %v214_v50 = vsel %vm116_vm6, 1, %v1167_v0  ;;  %v1767_v40 = vld [vmem:[%s3409_s1 + $0xb8] sm:$0xff] }
  0x6c   :  { %814 = vst [vmem:[%s3410_s2 + $0x108] sm:$0xff] %v478_v42  ;;  %345 = vperm.xlu2 %1124, %v206_v43   ;;  %342 = vperm.xlu1 %1123, %v205_v44   ;;  %v1617_v44 = vld [vmem:[%s3409_s1] sm:$0xff] }
  0x6d   :  { %815 = vst [vmem:[%s3410_s2 + $0x110] sm:$0xff] %v479_v45  ;;  %339 = vperm.xlu0 %1122, %v204_v46   ;;  %v1627_v46 = vld [vmem:[%s3409_s1 + $0x8] sm:$0xff] }
  0x6e   :  { %816 = vst [vmem:[%s3410_s2 + $0x118] sm:$0xff] %v480_v47  ;;  %v247_v55 = vpop.permute.xlu2 %246 }
  0x6f   :  { %vm397_vm14 = vcmp.eq.s32.totalorder %v247_v55, 1  ;;  %v1647_v55 = vld [vmem:[%s3409_s1 + $0x18] sm:$0xff] }
  0x70   :  { %v493_v58 = vsel %vm397_vm14, %v1471_v51, 0.0  ;;  %v494_v59 = vsel %vm397_vm14, %v1476_v52, 0.0  ;;  %v495_v60 = vsel %vm397_vm14, %v1481_v53, 0.0  ;;  %v496_v61 = vsel %vm397_vm14, %v1489_v54, 0.0 }
  0x71   :  { %829 = vst [vmem:[%s3410_s2 + $0x180] sm:$0xff] %v493_v58  ;;  %v497_v1 = vsel %vm397_vm14, %v1494_v56, 0.0  ;;  %v498_v3 = vsel %vm397_vm14, %v1499_v57, 0.0 }
  0x72   :  { %830 = vst [vmem:[%s3410_s2 + $0x188] sm:$0xff] %v494_v59 }
  0x73   :  { %831 = vst [vmem:[%s3410_s2 + $0x190] sm:$0xff] %v495_v60  ;;  %v213_v60 = vsel %vm115_vm8, 1, %v1167_v0 }
  0x74   :  { %832 = vst [vmem:[%s3410_s2 + $0x198] sm:$0xff] %v496_v61  ;;  %354 = vperm.xlu2 %1124, %v209_v62   ;;  %351 = vperm.xlu1 %1123, %v208_v63   ;;  %v1658_v61 = vld [vmem:[%s3409_s1 + $0x20] sm:$0xff]  ;;  %v1668_v63 = vld [vmem:[%s3409_s1 + $0x28] sm:$0xff] }
  0x75   :  { %833 = vst [vmem:[%s3410_s2 + $0x1a0] sm:$0xff] %v497_v1  ;;  %348 = vperm.xlu0 %1122, %v207_v2  }
  0x76   :  { %834 = vst [vmem:[%s3410_s2 + $0x1a8] sm:$0xff] %v498_v3  ;;  %v256_v7 = vpop.permute.xlu2 %255  ;;  %v229_v8 = vpop.permute.xlu1 %228 }
  0x77   :  { %vm400_vm2 = vcmp.eq.s32.totalorder %v256_v7, 1  ;;  %vm391_vm4 = vcmp.eq.s32.totalorder %v229_v8, 1  ;;  %v223_v29 = vpop.permute.xlu0 %222 }
  0x78   :  { %v511_v9 = vsel %vm400_vm2, %v1342_v13, 0.0  ;;  %v512_v10 = vsel %vm400_vm2, %v1347_v14, 0.0  ;;  %v513_v11 = vsel %vm400_vm2, %v1352_v15, 0.0  ;;  %v514_v12 = vsel %vm400_vm2, %v1357_v16, 0.0 }
  0x79   :  { %847 = vst [vmem:[%s3410_s2 + $0x210] sm:$0xff] %v511_v9  ;;  %v515_v22 = vsel %vm400_vm2, %v1362_v18, 0.0  ;;  %v516_v25 = vsel %vm400_vm2, %v1367_v19, 0.0  ;;  %v457_v28 = vsel %vm391_vm4, %v1547_v17, 0.0  ;;  %v458_v36 = vsel %vm391_vm4, %v1558_v23, 0.0 }
  0x7a   :  { %848 = vst [vmem:[%s3410_s2 + $0x218] sm:$0xff] %v512_v10  ;;  %v459_v42 = vsel %vm391_vm4, %v1568_v26, 0.0  ;;  %v460_v43 = vsel %vm391_vm4, %v1576_v27, 0.0  ;;  %vm389_vm7 = vcmp.eq.s32.totalorder %v223_v29, 1  ;;  %v461_v45 = vsel %vm391_vm4, %v1589_v31, 0.0  ;;  %v1710_v10 = vld [vmem:[%s3409_s1 + $0x90] sm:$0xff] }
  0x7b   :  { %849 = vst [vmem:[%s3410_s2 + $0x220] sm:$0xff] %v513_v11  ;;  %v462_v47 = vsel %vm391_vm4, %v1605_v41, 0.0  ;;  %v445_v58 = vsel %vm389_vm7, %v1617_v44, 0.0  ;;  %v446_v62 = vsel %vm389_vm7, %v1627_v46, 0.0  ;;  %v447_v1 = vsel %vm389_vm7, %v1637_v48, 0.0  ;;  %v63_v29 = vld [vmem:[%s3408_s0 + $0x1a0] sm:$0xff] }
  0x7c   :  { %850 = vst [vmem:[%s3410_s2 + $0x228] sm:$0xff] %v514_v12  ;;  %363 = vperm.xlu2 %1124, %v212_v20   ;;  %360 = vperm.xlu1 %1123, %v211_v21   ;;  %v448_v2 = vsel %vm389_vm7, %v1647_v55, 0.0  ;;  %v449_v3 = vsel %vm389_vm7, %v1658_v61, 0.0  ;;  %v450_v4 = vsel %vm389_vm7, %v1668_v63, 0.0  ;;  %v1720_v12 = vld [vmem:[%s3409_s1 + $0x98] sm:$0xff]  ;;  %v1730_v21 = vld [vmem:[%s3409_s1 + $0xa0] sm:$0xff] }
  0x7d   :  { %851 = vst [vmem:[%s3410_s2 + $0x230] sm:$0xff] %v515_v22  ;;  %357 = vperm.xlu0 %1122, %v210_v24   ;;  %v1735_v22 = vld [vmem:[%s3409_s1 + $0xa8] sm:$0xff]  ;;  %vm119_vm12 = vcmp.gt.s32.totalorder %v63_v29, 0  ;;  %v65_v29 = vld [vmem:[%s3408_s0 + $0x1b0] sm:$0xff] }
  0x7e   :  { %852 = vst [vmem:[%s3410_s2 + $0x238] sm:$0xff] %v516_v25  ;;  %v265_v59 = vpop.permute.xlu2 %264  ;;  %v232_v6 = vpop.permute.xlu1 %231  ;;  %vm121_vm2 = vcmp.gt.s32.totalorder %v65_v29, 0 }
  0x7f   :  { %793 = vst [vmem:[%s3410_s2 + $0x60] sm:$0xff] %v457_v28  ;;  %vm403_vm9 = vcmp.eq.s32.totalorder %v265_v59, 1  ;;  %vm392_vm10 = vcmp.eq.s32.totalorder %v232_v6, 1  ;;  %v226_v25 = vpop.permute.xlu0 %225  ;;  %v64_v28 = vld [vmem:[%s3408_s0 + $0x1a8] sm:$0xff] }
  0x80   :  { %794 = vst [vmem:[%s3410_s2 + $0x68] sm:$0xff] %v458_v36  ;;  %v529_v5 = vsel %vm403_vm9, %v1617_v44, 0.0  ;;  %v530_v7 = vsel %vm403_vm9, %v1627_v46, 0.0  ;;  %v531_v8 = vsel %vm403_vm9, %v1637_v48, 0.0  ;;  %v532_v9 = vsel %vm403_vm9, %v1647_v55, 0.0  ;;  %v1757_v36 = vld [vmem:[%s3409_s1 + $0xb0] sm:$0xff] }
  0x81   :  { %795 = vst [vmem:[%s3410_s2 + $0x70] sm:$0xff] %v459_v42  ;;  %v533_v11 = vsel %vm403_vm9, %v1658_v61, 0.0  ;;  %v534_v20 = vsel %vm403_vm9, %v1668_v63, 0.0  ;;  %v463_v24 = vsel %vm392_vm10, %v1710_v10, 0.0  ;;  %v464_v39 = vsel %vm392_vm10, %v1720_v12, 0.0 }
  0x82   :  { %796 = vst [vmem:[%s3410_s2 + $0x78] sm:$0xff] %v460_v43  ;;  %vm120_vm11 = vcmp.gt.s32.totalorder %v64_v28, 0  ;;  %v465_v42 = vsel %vm392_vm10, %v1730_v21, 0.0  ;;  %vm390_vm14 = vcmp.eq.s32.totalorder %v226_v25, 1  ;;  %v66_v28 = vld [vmem:[%s3408_s0 + $0x1b8] sm:$0xff] }
  0x83   :  { %797 = vst [vmem:[%s3410_s2 + $0x80] sm:$0xff] %v461_v45  ;;  %v218_v43 = vsel %vm120_vm11, 1, %v1167_v0  ;;  %v217_v45 = vsel %vm119_vm12, 1, %v1167_v0  ;;  %v451_v59 = vsel %vm390_vm14, %v1471_v51, 0.0  ;;  %vm122_vm1 = vcmp.gt.s32.totalorder %v66_v28, 0 }
  0x84   :  { %798 = vst [vmem:[%s3410_s2 + $0x88] sm:$0xff] %v462_v47  ;;  %372 = vperm.xlu2 %1124, %v215_v49   ;;  %369 = vperm.xlu1 %1123, %v214_v50   ;;  %v216_v47 = vsel %vm118_vm13, 1, %v1167_v0  ;;  %v466_v49 = vsel %vm392_vm10, %v1735_v22, 0.0  ;;  %v467_v50 = vsel %vm392_vm10, %v1757_v36, 0.0 }
  0x85   :  { %781 = vst [vmem:[%s3410_s2] sm:$0xff] %v445_v58  ;;  %366 = vperm.xlu0 %1122, %v213_v60   ;;  %v468_v58 = vsel %vm392_vm10, %v1767_v40, 0.0 }
  0x86   :  { %782 = vst [vmem:[%s3410_s2 + $0x8] sm:$0xff] %v446_v62  ;;  %v274_v60 = vpop.permute.xlu2 %273  ;;  %v452_v62 = vsel %vm390_vm14, %v1476_v52, 0.0  ;;  %v244_v6 = vpop.permute.xlu1 %243 }
  0x87   :  { %783 = vst [vmem:[%s3410_s2 + $0x10] sm:$0xff] %v447_v1  ;;  %v453_v1 = vsel %vm390_vm14, %v1481_v53, 0.0  ;;  %vm406_vm15 = vcmp.eq.s32.totalorder %v274_v60, 1  ;;  %vm396_vm0 = vcmp.eq.s32.totalorder %v244_v6, 1  ;;  %v241_v25 = vpop.permute.xlu0 %240 }
  0x88   :  { %784 = vst [vmem:[%s3410_s2 + $0x18] sm:$0xff] %v448_v2  ;;  %v454_v2 = vsel %vm390_vm14, %v1489_v54, 0.0  ;;  %v488_v30 = vsel %vm396_vm0, %v1627_v46, 0.0  ;;  %vm395_vm3 = vcmp.eq.s32.totalorder %v241_v25, 1 }
  0x89   :  { %785 = vst [vmem:[%s3410_s2 + $0x20] sm:$0xff] %v449_v3  ;;  %v455_v3 = vsel %vm390_vm14, %v1494_v56, 0.0 }
  0x8a   :  { %786 = vst [vmem:[%s3410_s2 + $0x28] sm:$0xff] %v450_v4  ;;  %v456_v4 = vsel %vm390_vm14, %v1499_v57, 0.0 }
  0x8b   :  { %865 = vst [vmem:[%s3410_s2 + $0x2a0] sm:$0xff] %v529_v5  ;;  %v547_v5 = vsel %vm406_vm15, %v1710_v10, 0.0 }
  0x8c   :  { %866 = vst [vmem:[%s3410_s2 + $0x2a8] sm:$0xff] %v530_v7  ;;  %381 = vperm.xlu2 %1124, %v218_v43   ;;  %378 = vperm.xlu1 %1123, %v217_v45   ;;  %v548_v7 = vsel %vm406_vm15, %v1720_v12, 0.0  ;;  %v219_v43 = vsel %vm121_vm2, 1, %v1167_v0  ;;  %v490_v45 = vsel %vm396_vm0, %v1647_v55, 0.0 }
  0x8d   :  { %867 = vst [vmem:[%s3410_s2 + $0x2b0] sm:$0xff] %v531_v8  ;;  %375 = vperm.xlu0 %1122, %v216_v47   ;;  %v549_v8 = vsel %vm406_vm15, %v1730_v21, 0.0  ;;  %v1880_v47 = vld [vmem:[%s3409_s1 + $0x120] sm:$0xff] }
  0x8e   :  { %868 = vst [vmem:[%s3410_s2 + $0x2b8] sm:$0xff] %v532_v9  ;;  %v550_v9 = vsel %vm406_vm15, %v1735_v22, 0.0  ;;  %v481_v60 = vsel %vm395_vm3, %v1880_v47, 0.0 }
  0x8f   :  { %869 = vst [vmem:[%s3410_s2 + $0x2c0] sm:$0xff] %v533_v11  ;;  %v551_v11 = vsel %vm406_vm15, %v1757_v36, 0.0 }
  0x90   :  { %870 = vst [vmem:[%s3410_s2 + $0x2c8] sm:$0xff] %v534_v20  ;;  %v552_v20 = vsel %vm406_vm15, %v1767_v40, 0.0 }
  0x91   :  { %799 = vst [vmem:[%s3410_s2 + $0x90] sm:$0xff] %v463_v24  ;;  %v487_v24 = vsel %vm396_vm0, %v1617_v44, 0.0 }
  0x92   :  { %800 = vst [vmem:[%s3410_s2 + $0x98] sm:$0xff] %v464_v39  ;;  %v489_v39 = vsel %vm396_vm0, %v1637_v48, 0.0 }
  0x93   :  { %801 = vst [vmem:[%s3410_s2 + $0xa0] sm:$0xff] %v465_v42  ;;  %v220_v42 = vsel %vm122_vm1, 1, %v1167_v0  ;;  %v1890_v0 = vld [vmem:[%s3409_s1 + $0x128] sm:$0xff] }
  0x94   :  { %802 = vst [vmem:[%s3410_s2 + $0xa8] sm:$0xff] %v466_v49  ;;  %387 = vperm.xlu1 %1123, %v220_v42   ;;  %v491_v49 = vsel %vm396_vm0, %v1658_v61, 0.0 }
  0x95   :  { %803 = vst [vmem:[%s3410_s2 + $0xb0] sm:$0xff] %v467_v50  ;;  %384 = vperm.xlu0 %1122, %v219_v43   ;;  %v492_v50 = vsel %vm396_vm0, %v1668_v63, 0.0 }
  0x96   :  { %804 = vst [vmem:[%s3410_s2 + $0xb8] sm:$0xff] %v468_v58  ;;  %v1900_v58 = vld [vmem:[%s3409_s1 + $0x130] sm:$0xff] }
  0x97   :  { %787 = vst [vmem:[%s3410_s2 + $0x30] sm:$0xff] %v451_v59  ;;  %v1908_v59 = vld [vmem:[%s3409_s1 + $0x138] sm:$0xff] }
  0x98   :  { %788 = vst [vmem:[%s3410_s2 + $0x38] sm:$0xff] %v452_v62  ;;  %v283_v62 = vpop.permute.xlu2 %282 }
  0x99   :  { %789 = vst [vmem:[%s3410_s2 + $0x40] sm:$0xff] %v453_v1  ;;  %v1918_v1 = vld [vmem:[%s3409_s1 + $0x140] sm:$0xff]  ;;  %vm409_vm4 = vcmp.eq.s32.totalorder %v283_v62, 1 }
  0x9a   :  { %790 = vst [vmem:[%s3410_s2 + $0x48] sm:$0xff] %v454_v2  ;;  %v482_v2 = vsel %vm395_vm3, %v1890_v0, 0.0  ;;  %v485_v6 = vsel %vm395_vm3, %v1918_v1, 0.0  ;;  %v569_v25 = vsel %vm409_vm4, %v1918_v1, 0.0 }
  0x9b   :  { %791 = vst [vmem:[%s3410_s2 + $0x50] sm:$0xff] %v455_v3  ;;  %v1928_v3 = vld [vmem:[%s3409_s1 + $0x148] sm:$0xff] }
  0x9c   :  { %792 = vst [vmem:[%s3410_s2 + $0x58] sm:$0xff] %v456_v4  ;;  %v483_v4 = vsel %vm395_vm3, %v1900_v58, 0.0  ;;  %v570_v28 = vsel %vm409_vm4, %v1928_v3, 0.0 }
  0x9d   :  { %883 = vst [vmem:[%s3410_s2 + $0x330] sm:$0xff] %v547_v5  ;;  %v484_v5 = vsel %vm395_vm3, %v1908_v59, 0.0 }
  0x9e   :  { %884 = vst [vmem:[%s3410_s2 + $0x338] sm:$0xff] %v548_v7  ;;  %v486_v7 = vsel %vm395_vm3, %v1928_v3, 0.0 }
  0x9f   :  { %885 = vst [vmem:[%s3410_s2 + $0x340] sm:$0xff] %v549_v8  ;;  %v565_v8 = vsel %vm409_vm4, %v1880_v47, 0.0 }
  0xa0   :  { %886 = vst [vmem:[%s3410_s2 + $0x348] sm:$0xff] %v550_v9  ;;  %v253_v9 = vpop.permute.xlu1 %252 }
  0xa1   :  { %887 = vst [vmem:[%s3410_s2 + $0x350] sm:$0xff] %v551_v11  ;;  %v566_v11 = vsel %vm409_vm4, %v1890_v0, 0.0  ;;  %vm399_vm5 = vcmp.eq.s32.totalorder %v253_v9, 1 }
  0xa2   :  { %888 = vst [vmem:[%s3410_s2 + $0x358] sm:$0xff] %v552_v20  ;;  %v567_v20 = vsel %vm409_vm4, %v1900_v58, 0.0  ;;  %v505_v29 = vsel %vm399_vm5, %v1710_v10, 0.0  ;;  %v507_v42 = vsel %vm399_vm5, %v1730_v21, 0.0  ;;  %v508_v43 = vsel %vm399_vm5, %v1735_v22, 0.0 }
  0xa3   :  { %823 = vst [vmem:[%s3410_s2 + $0x150] sm:$0xff] %v487_v24  ;;  %v568_v24 = vsel %vm409_vm4, %v1908_v59, 0.0 }
  0xa4   :  { %824 = vst [vmem:[%s3410_s2 + $0x158] sm:$0xff] %v488_v30  ;;  %v250_v30 = vpop.permute.xlu0 %249 }
  0xa5   :  { %825 = vst [vmem:[%s3410_s2 + $0x160] sm:$0xff] %v489_v39  ;;  %v506_v39 = vsel %vm399_vm5, %v1720_v12, 0.0  ;;  %vm398_vm6 = vcmp.eq.s32.totalorder %v250_v30, 1 }
  0xa6   :  { %826 = vst [vmem:[%s3410_s2 + $0x168] sm:$0xff] %v490_v45  ;;  %v509_v45 = vsel %vm399_vm5, %v1757_v36, 0.0  ;;  %v500_v62 = vsel %vm398_vm6, %v1558_v23, 0.0 }
  0xa7   :  { %827 = vst [vmem:[%s3410_s2 + $0x170] sm:$0xff] %v491_v49  ;;  %v510_v49 = vsel %vm399_vm5, %v1767_v40, 0.0 }
  0xa8   :  { %828 = vst [vmem:[%s3410_s2 + $0x178] sm:$0xff] %v492_v50  ;;  %v499_v50 = vsel %vm398_vm6, %v1547_v17, 0.0 }
  0xa9   :  { %817 = vst [vmem:[%s3410_s2 + $0x120] sm:$0xff] %v481_v60  ;;  %v292_v60 = vpop.permute.xlu2 %291 }
  0xaa   :  { %818 = vst [vmem:[%s3410_s2 + $0x128] sm:$0xff] %v482_v2  ;;  %v501_v2 = vsel %vm398_vm6, %v1568_v26, 0.0  ;;  %vm412_vm7 = vcmp.eq.s32.totalorder %v292_v60, 1 }
  0xab   :  { %819 = vst [vmem:[%s3410_s2 + $0x130] sm:$0xff] %v483_v4  ;;  %v502_v4 = vsel %vm398_vm6, %v1576_v27, 0.0  ;;  %v584_v9 = vsel %vm412_vm7, %v1558_v23, 0.0 }
  0xac   :  { %820 = vst [vmem:[%s3410_s2 + $0x138] sm:$0xff] %v484_v5  ;;  %v503_v5 = vsel %vm398_vm6, %v1589_v31, 0.0 }
  0xad   :  { %821 = vst [vmem:[%s3410_s2 + $0x140] sm:$0xff] %v485_v6  ;;  %v504_v6 = vsel %vm398_vm6, %v1605_v41, 0.0 }
  0xae   :  { %822 = vst [vmem:[%s3410_s2 + $0x148] sm:$0xff] %v486_v7  ;;  %v583_v7 = vsel %vm412_vm7, %v1547_v17, 0.0 }
  0xaf   :  { %901 = vst [vmem:[%s3410_s2 + $0x3c0] sm:$0xff] %v565_v8  ;;  %v262_v8 = vpop.permute.xlu1 %261 }
  0xb0   :  { %902 = vst [vmem:[%s3410_s2 + $0x3c8] sm:$0xff] %v566_v11  ;;  %v585_v11 = vsel %vm412_vm7, %v1568_v26, 0.0  ;;  %vm402_vm8 = vcmp.eq.s32.totalorder %v262_v8, 1 }
  0xb1   :  { %903 = vst [vmem:[%s3410_s2 + $0x3d0] sm:$0xff] %v567_v20  ;;  %v586_v20 = vsel %vm412_vm7, %v1576_v27, 0.0  ;;  %v524_v30 = vsel %vm402_vm8, %v1890_v0, 0.0 }
  0xb2   :  { %904 = vst [vmem:[%s3410_s2 + $0x3d8] sm:$0xff] %v568_v24  ;;  %v587_v24 = vsel %vm412_vm7, %v1589_v31, 0.0 }
  0xb3   :  { %905 = vst [vmem:[%s3410_s2 + $0x3e0] sm:$0xff] %v569_v25  ;;  %v588_v25 = vsel %vm412_vm7, %v1605_v41, 0.0 }
  0xb4   :  { %906 = vst [vmem:[%s3410_s2 + $0x3e8] sm:$0xff] %v570_v28  ;;  %v523_v28 = vsel %vm402_vm8, %v1880_v47, 0.0 }
  0xb5   :  { %841 = vst [vmem:[%s3410_s2 + $0x1e0] sm:$0xff] %v505_v29  ;;  %v259_v29 = vpop.permute.xlu0 %258 }
  0xb6   :  { %842 = vst [vmem:[%s3410_s2 + $0x1e8] sm:$0xff] %v506_v39  ;;  %v525_v39 = vsel %vm402_vm8, %v1900_v58, 0.0  ;;  %vm401_vm9 = vcmp.eq.s32.totalorder %v259_v29, 1 }
  0xb7   :  { %843 = vst [vmem:[%s3410_s2 + $0x1f0] sm:$0xff] %v507_v42  ;;  %v526_v42 = vsel %vm402_vm8, %v1908_v59, 0.0  ;;  %v518_v60 = vsel %vm401_vm9, %v1410_v33, 0.0 }
  0xb8   :  { %844 = vst [vmem:[%s3410_s2 + $0x1f8] sm:$0xff] %v508_v43  ;;  %v527_v43 = vsel %vm402_vm8, %v1918_v1, 0.0 }
  0xb9   :  { %845 = vst [vmem:[%s3410_s2 + $0x200] sm:$0xff] %v509_v45  ;;  %v528_v45 = vsel %vm402_vm8, %v1928_v3, 0.0 }
  0xba   :  { %846 = vst [vmem:[%s3410_s2 + $0x208] sm:$0xff] %v510_v49  ;;  %v517_v49 = vsel %vm401_vm9, %v1405_v32, 0.0 }
  0xbb   :  { %835 = vst [vmem:[%s3410_s2 + $0x1b0] sm:$0xff] %v499_v50  ;;  %v301_v50 = vpop.permute.xlu2 %300 }
  0xbc   :  { %836 = vst [vmem:[%s3410_s2 + $0x1b8] sm:$0xff] %v500_v62  ;;  %v519_v62 = vsel %vm401_vm9, %v1415_v34, 0.0  ;;  %vm415_vm10 = vcmp.eq.s32.totalorder %v301_v50, 1 }
  0xbd   :  { %837 = vst [vmem:[%s3410_s2 + $0x1c0] sm:$0xff] %v501_v2  ;;  %v520_v2 = vsel %vm401_vm9, %v1423_v35, 0.0  ;;  %v602_v8 = vsel %vm415_vm10, %v1410_v33, 0.0 }
  0xbe   :  { %838 = vst [vmem:[%s3410_s2 + $0x1c8] sm:$0xff] %v502_v4  ;;  %v521_v4 = vsel %vm401_vm9, %v1428_v37, 0.0 }
  0xbf   :  { %839 = vst [vmem:[%s3410_s2 + $0x1d0] sm:$0xff] %v503_v5  ;;  %v522_v5 = vsel %vm401_vm9, %v1433_v38, 0.0 }
  0xc0   :  { %840 = vst [vmem:[%s3410_s2 + $0x1d8] sm:$0xff] %v504_v6  ;;  %v601_v6 = vsel %vm415_vm10, %v1405_v32, 0.0 }
  0xc1   :  { %919 = vst [vmem:[%s3410_s2 + $0x450] sm:$0xff] %v583_v7  ;;  %v271_v7 = vpop.permute.xlu1 %270 }
  0xc2   :  { %920 = vst [vmem:[%s3410_s2 + $0x458] sm:$0xff] %v584_v9  ;;  %v603_v9 = vsel %vm415_vm10, %v1415_v34, 0.0  ;;  %vm405_vm11 = vcmp.eq.s32.totalorder %v271_v7, 1 }
  0xc3   :  { %921 = vst [vmem:[%s3410_s2 + $0x460] sm:$0xff] %v585_v11  ;;  %v604_v11 = vsel %vm415_vm10, %v1423_v35, 0.0  ;;  %v542_v29 = vsel %vm405_vm11, %v1558_v23, 0.0 }
  0xc4   :  { %922 = vst [vmem:[%s3410_s2 + $0x468] sm:$0xff] %v586_v20  ;;  %v605_v20 = vsel %vm415_vm10, %v1428_v37, 0.0 }
  0xc5   :  { %923 = vst [vmem:[%s3410_s2 + $0x470] sm:$0xff] %v587_v24  ;;  %v606_v24 = vsel %vm415_vm10, %v1433_v38, 0.0 }
  0xc6   :  { %924 = vst [vmem:[%s3410_s2 + $0x478] sm:$0xff] %v588_v25  ;;  %v541_v25 = vsel %vm405_vm11, %v1547_v17, 0.0 }
  0xc7   :  { %859 = vst [vmem:[%s3410_s2 + $0x270] sm:$0xff] %v523_v28  ;;  %v268_v28 = vpop.permute.xlu0 %267 }
  0xc8   :  { %860 = vst [vmem:[%s3410_s2 + $0x278] sm:$0xff] %v524_v30  ;;  %v543_v30 = vsel %vm405_vm11, %v1568_v26, 0.0  ;;  %vm404_vm12 = vcmp.eq.s32.totalorder %v268_v28, 1 }
  0xc9   :  { %861 = vst [vmem:[%s3410_s2 + $0x280] sm:$0xff] %v525_v39  ;;  %v544_v39 = vsel %vm405_vm11, %v1576_v27, 0.0  ;;  %v536_v50 = vsel %vm404_vm12, %v1476_v52, 0.0 }
  0xca   :  { %862 = vst [vmem:[%s3410_s2 + $0x288] sm:$0xff] %v526_v42  ;;  %v545_v42 = vsel %vm405_vm11, %v1589_v31, 0.0 }
  0xcb   :  { %863 = vst [vmem:[%s3410_s2 + $0x290] sm:$0xff] %v527_v43  ;;  %v546_v43 = vsel %vm405_vm11, %v1605_v41, 0.0 }
  0xcc   :  { %864 = vst [vmem:[%s3410_s2 + $0x298] sm:$0xff] %v528_v45  ;;  %v535_v45 = vsel %vm404_vm12, %v1471_v51, 0.0 }
  0xcd   :  { %853 = vst [vmem:[%s3410_s2 + $0x240] sm:$0xff] %v517_v49  ;;  %v310_v49 = vpop.permute.xlu2 %309 }
  0xce   :  { %854 = vst [vmem:[%s3410_s2 + $0x248] sm:$0xff] %v518_v60  ;;  %v537_v60 = vsel %vm404_vm12, %v1481_v53, 0.0  ;;  %vm418_vm13 = vcmp.eq.s32.totalorder %v310_v49, 1 }
  0xcf   :  { %855 = vst [vmem:[%s3410_s2 + $0x250] sm:$0xff] %v519_v62  ;;  %v538_v62 = vsel %vm404_vm12, %v1489_v54, 0.0  ;;  %v620_v7 = vsel %vm418_vm13, %v1476_v52, 0.0 }
  0xd0   :  { %856 = vst [vmem:[%s3410_s2 + $0x258] sm:$0xff] %v520_v2  ;;  %v539_v2 = vsel %vm404_vm12, %v1494_v56, 0.0 }
  0xd1   :  { %857 = vst [vmem:[%s3410_s2 + $0x260] sm:$0xff] %v521_v4  ;;  %v540_v4 = vsel %vm404_vm12, %v1499_v57, 0.0 }
  0xd2   :  { %858 = vst [vmem:[%s3410_s2 + $0x268] sm:$0xff] %v522_v5  ;;  %v619_v5 = vsel %vm418_vm13, %v1471_v51, 0.0 }
  0xd3   :  { %937 = vst [vmem:[%s3410_s2 + $0x4e0] sm:$0xff] %v601_v6  ;;  %v280_v6 = vpop.permute.xlu1 %279 }
  0xd4   :  { %938 = vst [vmem:[%s3410_s2 + $0x4e8] sm:$0xff] %v602_v8  ;;  %v621_v8 = vsel %vm418_vm13, %v1481_v53, 0.0  ;;  %vm408_vm14 = vcmp.eq.s32.totalorder %v280_v6, 1 }
  0xd5   :  { %939 = vst [vmem:[%s3410_s2 + $0x4f0] sm:$0xff] %v603_v9  ;;  %v622_v9 = vsel %vm418_vm13, %v1489_v54, 0.0  ;;  %v560_v28 = vsel %vm408_vm14, %v1410_v33, 0.0  ;;  %v564_v33 = vsel %vm408_vm14, %v1433_v38, 0.0 }
  0xd6   :  { %940 = vst [vmem:[%s3410_s2 + $0x4f8] sm:$0xff] %v604_v11  ;;  %v623_v11 = vsel %vm418_vm13, %v1494_v56, 0.0 }
  0xd7   :  { %941 = vst [vmem:[%s3410_s2 + $0x500] sm:$0xff] %v605_v20  ;;  %v624_v20 = vsel %vm418_vm13, %v1499_v57, 0.0 }
  0xd8   :  { %942 = vst [vmem:[%s3410_s2 + $0x508] sm:$0xff] %v606_v24  ;;  %v559_v24 = vsel %vm408_vm14, %v1405_v32, 0.0  ;;  %v563_v32 = vsel %vm408_vm14, %v1428_v37, 0.0 }
  0xd9   :  { %877 = vst [vmem:[%s3410_s2 + $0x300] sm:$0xff] %v541_v25  ;;  %v277_v25 = vpop.permute.xlu0 %276 }
  0xda   :  { %878 = vst [vmem:[%s3410_s2 + $0x308] sm:$0xff] %v542_v29  ;;  %v561_v29 = vsel %vm408_vm14, %v1415_v34, 0.0  ;;  %vm407_vm15 = vcmp.eq.s32.totalorder %v277_v25, 1 }
  0xdb   :  { %879 = vst [vmem:[%s3410_s2 + $0x310] sm:$0xff] %v543_v30  ;;  %v562_v30 = vsel %vm408_vm14, %v1423_v35, 0.0  ;;  %v553_v34 = vsel %vm407_vm15, %v1342_v13, 0.0  ;;  %v319_v35 = vpop.permute.xlu2 %318  ;;  %v554_v37 = vsel %vm407_vm15, %v1347_v14, 0.0  ;;  %v555_v38 = vsel %vm407_vm15, %v1352_v15, 0.0  ;;  %v289_v49 = vpop.permute.xlu1 %288 }
  0xdc   :  { %880 = vst [vmem:[%s3410_s2 + $0x318] sm:$0xff] %v544_v39  ;;  %v556_v39 = vsel %vm407_vm15, %v1357_v16, 0.0  ;;  %vm421_vm0 = vcmp.eq.s32.totalorder %v319_v35, 1  ;;  %vm411_vm1 = vcmp.eq.s32.totalorder %v289_v49, 1 }
  0xdd   :  { %881 = vst [vmem:[%s3410_s2 + $0x320] sm:$0xff] %v545_v42  ;;  %v557_v42 = vsel %vm407_vm15, %v1362_v18, 0.0 }
  0xde   :  { %882 = vst [vmem:[%s3410_s2 + $0x328] sm:$0xff] %v546_v43  ;;  %v558_v43 = vsel %vm407_vm15, %v1367_v19, 0.0 }
  0xdf   :  { %871 = vst [vmem:[%s3410_s2 + $0x2d0] sm:$0xff] %v535_v45  ;;  %v637_v45 = vsel %vm421_vm0, %v1342_v13, 0.0  ;;  %v641_v13 = vsel %vm421_vm0, %v1362_v18, 0.0  ;;  %v578_v18 = vsel %vm411_vm1, %v1476_v52, 0.0  ;;  %v582_v52 = vsel %vm411_vm1, %v1499_v57, 0.0 }
  0xe0   :  { %872 = vst [vmem:[%s3410_s2 + $0x2d8] sm:$0xff] %v536_v50  ;;  %v638_v50 = vsel %vm421_vm0, %v1347_v14, 0.0  ;;  %v642_v14 = vsel %vm421_vm0, %v1367_v19, 0.0  ;;  %v579_v19 = vsel %vm411_vm1, %v1481_v53, 0.0 }
  0xe1   :  { %873 = vst [vmem:[%s3410_s2 + $0x2e0] sm:$0xff] %v537_v60  ;;  %v639_v60 = vsel %vm421_vm0, %v1352_v15, 0.0  ;;  %v577_v15 = vsel %vm411_vm1, %v1471_v51, 0.0  ;;  %v581_v51 = vsel %vm411_vm1, %v1494_v56, 0.0 }
  0xe2   :  { %874 = vst [vmem:[%s3410_s2 + $0x2e8] sm:$0xff] %v538_v62  ;;  %v640_v62 = vsel %vm421_vm0, %v1357_v16, 0.0  ;;  %v286_v16 = vpop.permute.xlu0 %285 }
  0xe3   :  { %875 = vst [vmem:[%s3410_s2 + $0x2f0] sm:$0xff] %v539_v2  ;;  %v580_v2 = vsel %vm411_vm1, %v1489_v54, 0.0  ;;  %vm410_vm2 = vcmp.eq.s32.totalorder %v286_v16, 1  ;;  %v328_v54 = vpop.permute.xlu2 %327 }
  0xe4   :  { %876 = vst [vmem:[%s3410_s2 + $0x2f8] sm:$0xff] %v540_v4  ;;  %v571_v53 = vsel %vm410_vm2, %v1617_v44, 0.0  ;;  %v572_v56 = vsel %vm410_vm2, %v1627_v46, 0.0  ;;  %v573_v57 = vsel %vm410_vm2, %v1637_v48, 0.0  ;;  %v574_v4 = vsel %vm410_vm2, %v1647_v55, 0.0 }
  0xe5   :  { %955 = vst [vmem:[%s3410_s2 + $0x570] sm:$0xff] %v619_v5  ;;  %vm424_vm3 = vcmp.eq.s32.totalorder %v328_v54, 1  ;;  %v575_v5 = vsel %vm410_vm2, %v1658_v61, 0.0  ;;  %v576_v6 = vsel %vm410_vm2, %v1668_v63, 0.0 }
  0xe6   :  { %956 = vst [vmem:[%s3410_s2 + $0x578] sm:$0xff] %v620_v7  ;;  %v655_v7 = vsel %vm424_vm3, %v1617_v44, 0.0  ;;  %v660_v25 = vsel %vm424_vm3, %v1668_v63, 0.0 }
  0xe7   :  { %957 = vst [vmem:[%s3410_s2 + $0x580] sm:$0xff] %v621_v8  ;;  %v298_v8 = vpop.permute.xlu1 %297 }
  0xe8   :  { %958 = vst [vmem:[%s3410_s2 + $0x588] sm:$0xff] %v622_v9  ;;  %v656_v9 = vsel %vm424_vm3, %v1627_v46, 0.0  ;;  %vm414_vm4 = vcmp.eq.s32.totalorder %v298_v8, 1 }
  0xe9   :  { %959 = vst [vmem:[%s3410_s2 + $0x590] sm:$0xff] %v623_v11  ;;  %v657_v11 = vsel %vm424_vm3, %v1637_v48, 0.0 }
  0xea   :  { %960 = vst [vmem:[%s3410_s2 + $0x598] sm:$0xff] %v624_v20  ;;  %v658_v20 = vsel %vm424_vm3, %v1647_v55, 0.0 }
  0xeb   :  { %895 = vst [vmem:[%s3410_s2 + $0x390] sm:$0xff] %v559_v24  ;;  %v659_v24 = vsel %vm424_vm3, %v1658_v61, 0.0 }
  0xec   :  { %896 = vst [vmem:[%s3410_s2 + $0x398] sm:$0xff] %v560_v28  ;;  %v2433_v28 = vld [vmem:[%s3409_s1 + $0xc0] sm:$0xff] }
  0xed   :  { %897 = vst [vmem:[%s3410_s2 + $0x3a0] sm:$0xff] %v561_v29  ;;  %v595_v29 = vsel %vm414_vm4, %v2433_v28, 0.0 }
  0xee   :  { %898 = vst [vmem:[%s3410_s2 + $0x3a8] sm:$0xff] %v562_v30  ;;  %v295_v30 = vpop.permute.xlu0 %294 }
  0xef   :  { %899 = vst [vmem:[%s3410_s2 + $0x3b0] sm:$0xff] %v563_v32  ;;  %v2443_v32 = vld [vmem:[%s3409_s1 + $0xc8] sm:$0xff]  ;;  %vm413_vm5 = vcmp.eq.s32.totalorder %v295_v30, 1 }
  0xf0   :  { %900 = vst [vmem:[%s3410_s2 + $0x3b8] sm:$0xff] %v564_v33  ;;  %v596_v33 = vsel %vm414_vm4, %v2443_v32, 0.0  ;;  %v589_v49 = vsel %vm413_vm5, %v1710_v10, 0.0 }
  0xf1   :  { %889 = vst [vmem:[%s3410_s2 + $0x360] sm:$0xff] %v553_v34  ;;  %v2453_v34 = vld [vmem:[%s3409_s1 + $0xd0] sm:$0xff] }
  0xf2   :  { %890 = vst [vmem:[%s3410_s2 + $0x368] sm:$0xff] %v554_v37  ;;  %v597_v35 = vsel %vm414_vm4, %v2453_v34, 0.0  ;;  %v2460_v37 = vld [vmem:[%s3409_s1 + $0xd8] sm:$0xff] }
  0xf3   :  { %891 = vst [vmem:[%s3410_s2 + $0x370] sm:$0xff] %v555_v38  ;;  %v598_v38 = vsel %vm414_vm4, %v2460_v37, 0.0 }
  0xf4   :  { %892 = vst [vmem:[%s3410_s2 + $0x378] sm:$0xff] %v556_v39  ;;  %v2470_v39 = vld [vmem:[%s3409_s1 + $0xe0] sm:$0xff] }
  0xf5   :  { %893 = vst [vmem:[%s3410_s2 + $0x380] sm:$0xff] %v557_v42  ;;  %v599_v42 = vsel %vm414_vm4, %v2470_v39, 0.0 }
  0xf6   :  { %894 = vst [vmem:[%s3410_s2 + $0x388] sm:$0xff] %v558_v43  ;;  %v2480_v43 = vld [vmem:[%s3409_s1 + $0xe8] sm:$0xff] }
  0xf7   :  { %973 = vst [vmem:[%s3410_s2 + $0x600] sm:$0xff] %v637_v45  ;;  %v600_v45 = vsel %vm414_vm4, %v2480_v43, 0.0 }
  0xf8   :  { %974 = vst [vmem:[%s3410_s2 + $0x608] sm:$0xff] %v638_v50  ;;  %v337_v50 = vpop.permute.xlu2 %336 }
  0xf9   :  { %975 = vst [vmem:[%s3410_s2 + $0x610] sm:$0xff] %v639_v60  ;;  %v590_v60 = vsel %vm413_vm5, %v1720_v12, 0.0  ;;  %vm427_vm6 = vcmp.eq.s32.totalorder %v337_v50, 1  ;;  %v2703_v50 = vld [vmem:[%s3409_s1 + $0x60] sm:$0xff] }
  0xfa   :  { %976 = vst [vmem:[%s3410_s2 + $0x618] sm:$0xff] %v640_v62  ;;  %v591_v62 = vsel %vm413_vm5, %v1730_v21, 0.0  ;;  %v673_v16 = vsel %vm427_vm6, %v1710_v10, 0.0 }
  0xfb   :  { %977 = vst [vmem:[%s3410_s2 + $0x620] sm:$0xff] %v641_v13  ;;  %v592_v13 = vsel %vm413_vm5, %v1735_v22, 0.0 }
  0xfc   :  { %978 = vst [vmem:[%s3410_s2 + $0x628] sm:$0xff] %v642_v14  ;;  %v593_v14 = vsel %vm413_vm5, %v1757_v36, 0.0 }
  0xfd   :  { %913 = vst [vmem:[%s3410_s2 + $0x420] sm:$0xff] %v577_v15  ;;  %v594_v15 = vsel %vm413_vm5, %v1767_v40, 0.0 }
  0xfe   :  { %914 = vst [vmem:[%s3410_s2 + $0x428] sm:$0xff] %v578_v18  ;;  %v307_v18 = vpop.permute.xlu1 %306 }
  0xff   :  { %915 = vst [vmem:[%s3410_s2 + $0x430] sm:$0xff] %v579_v19  ;;  %v674_v19 = vsel %vm427_vm6, %v1720_v12, 0.0  ;;  %vm417_vm7 = vcmp.eq.s32.totalorder %v307_v18, 1 }
 0x100   :  { %916 = vst [vmem:[%s3410_s2 + $0x438] sm:$0xff] %v580_v2  ;;  %v675_v2 = vsel %vm427_vm6, %v1730_v21, 0.0  ;;  %v613_v54 = vsel %vm417_vm7, %v1617_v44, 0.0  ;;  %v617_v44 = vsel %vm417_vm7, %v1658_v61, 0.0 }
 0x101   :  { %917 = vst [vmem:[%s3410_s2 + $0x440] sm:$0xff] %v581_v51  ;;  %v676_v51 = vsel %vm427_vm6, %v1735_v22, 0.0 }
 0x102   :  { %918 = vst [vmem:[%s3410_s2 + $0x448] sm:$0xff] %v582_v52  ;;  %v677_v52 = vsel %vm427_vm6, %v1757_v36, 0.0 }
 0x103   :  { %907 = vst [vmem:[%s3410_s2 + $0x3f0] sm:$0xff] %v571_v53  ;;  %v678_v53 = vsel %vm427_vm6, %v1767_v40, 0.0 }
 0x104   :  { %908 = vst [vmem:[%s3410_s2 + $0x3f8] sm:$0xff] %v572_v56  ;;  %v304_v56 = vpop.permute.xlu0 %303 }
 0x105   :  { %909 = vst [vmem:[%s3410_s2 + $0x400] sm:$0xff] %v573_v57  ;;  %v614_v57 = vsel %vm417_vm7, %v1627_v46, 0.0  ;;  %vm416_vm8 = vcmp.eq.s32.totalorder %v304_v56, 1  ;;  %v618_v46 = vsel %vm417_vm7, %v1668_v63, 0.0 }
 0x106   :  { %910 = vst [vmem:[%s3410_s2 + $0x408] sm:$0xff] %v574_v4  ;;  %v615_v4 = vsel %vm417_vm7, %v1637_v48, 0.0  ;;  %v607_v48 = vsel %vm416_vm8, %v1880_v47, 0.0  ;;  %v608_v61 = vsel %vm416_vm8, %v1890_v0, 0.0  ;;  %v609_v63 = vsel %vm416_vm8, %v1900_v58, 0.0 }
 0x107   :  { %911 = vst [vmem:[%s3410_s2 + $0x410] sm:$0xff] %v575_v5  ;;  %v616_v5 = vsel %vm417_vm7, %v1647_v55, 0.0  ;;  %v346_v55 = vpop.permute.xlu2 %345  ;;  %v612_v8 = vsel %vm416_vm8, %v1928_v3, 0.0 }
 0x108   :  { %912 = vst [vmem:[%s3410_s2 + $0x418] sm:$0xff] %v576_v6  ;;  %v610_v6 = vsel %vm416_vm8, %v1908_v59, 0.0  ;;  %vm430_vm9 = vcmp.eq.s32.totalorder %v346_v55, 1 }
 0x109   :  { %991 = vst [vmem:[%s3410_s2 + $0x690] sm:$0xff] %v655_v7  ;;  %v611_v7 = vsel %vm416_vm8, %v1918_v1, 0.0  ;;  %v696_v30 = vsel %vm430_vm9, %v1928_v3, 0.0 }
 0x10a   :  { %992 = vst [vmem:[%s3410_s2 + $0x698] sm:$0xff] %v656_v9  ;;  %v691_v9 = vsel %vm430_vm9, %v1880_v47, 0.0 }
 0x10b   :  { %993 = vst [vmem:[%s3410_s2 + $0x6a0] sm:$0xff] %v657_v11  ;;  %v316_v11 = vpop.permute.xlu1 %315 }
 0x10c   :  { %994 = vst [vmem:[%s3410_s2 + $0x6a8] sm:$0xff] %v658_v20  ;;  %v692_v20 = vsel %vm430_vm9, %v1890_v0, 0.0  ;;  %vm420_vm10 = vcmp.eq.s32.totalorder %v316_v11, 1 }
 0x10d   :  { %995 = vst [vmem:[%s3410_s2 + $0x6b0] sm:$0xff] %v659_v24  ;;  %v693_v24 = vsel %vm430_vm9, %v1900_v58, 0.0 }
 0x10e   :  { %996 = vst [vmem:[%s3410_s2 + $0x6b8] sm:$0xff] %v660_v25  ;;  %v694_v25 = vsel %vm430_vm9, %v1908_v59, 0.0 }
 0x10f   :  { %931 = vst [vmem:[%s3410_s2 + $0x4b0] sm:$0xff] %v595_v29  ;;  %v695_v29 = vsel %vm430_vm9, %v1918_v1, 0.0 }
 0x110   :  { %932 = vst [vmem:[%s3410_s2 + $0x4b8] sm:$0xff] %v596_v33  ;;  %v631_v33 = vsel %vm420_vm10, %v1710_v10, 0.0  ;;  %v635_v10 = vsel %vm420_vm10, %v1757_v36, 0.0 }
 0x111   :  { %933 = vst [vmem:[%s3410_s2 + $0x4c0] sm:$0xff] %v597_v35  ;;  %v313_v35 = vpop.permute.xlu0 %312 }
 0x112   :  { %934 = vst [vmem:[%s3410_s2 + $0x4c8] sm:$0xff] %v598_v38  ;;  %v632_v38 = vsel %vm420_vm10, %v1720_v12, 0.0  ;;  %vm419_vm11 = vcmp.eq.s32.totalorder %v313_v35, 1  ;;  %v636_v12 = vsel %vm420_vm10, %v1767_v40, 0.0  ;;  %v2900_v35 = vld [vmem:[%s3409_s1 + $0x88] sm:$0xff] }
 0x113   :  { %935 = vst [vmem:[%s3410_s2 + $0x4d0] sm:$0xff] %v599_v42  ;;  %v633_v42 = vsel %vm420_vm10, %v1730_v21, 0.0  ;;  %v625_v21 = vsel %vm419_vm11, %v1547_v17, 0.0  ;;  %v626_v36 = vsel %vm419_vm11, %v1558_v23, 0.0  ;;  %v627_v40 = vsel %vm419_vm11, %v1568_v26, 0.0 }
 0x114   :  { %936 = vst [vmem:[%s3410_s2 + $0x4d8] sm:$0xff] %v600_v45  ;;  %v634_v45 = vsel %vm420_vm10, %v1735_v22, 0.0  ;;  %v355_v22 = vpop.permute.xlu2 %354  ;;  %v629_v17 = vsel %vm419_vm11, %v1589_v31, 0.0  ;;  %v630_v23 = vsel %vm419_vm11, %v1605_v41, 0.0 }
 0x115   :  { %925 = vst [vmem:[%s3410_s2 + $0x480] sm:$0xff] %v589_v49  ;;  %v628_v49 = vsel %vm419_vm11, %v1576_v27, 0.0  ;;  %vm433_vm12 = vcmp.eq.s32.totalorder %v355_v22, 1  ;;  %v2933_v22 = vld [vmem:[%s3409_s1 + $0x40] sm:$0xff] }
 0x116   :  { %926 = vst [vmem:[%s3410_s2 + $0x488] sm:$0xff] %v590_v60  ;;  %v709_v60 = vsel %vm433_vm12, %v2703_v50, 0.0  ;;  %v713_v18 = vsel %vm433_vm12, %v1589_v31, 0.0 }
 0x117   :  { %927 = vst [vmem:[%s3410_s2 + $0x490] sm:$0xff] %v591_v62  ;;  %v325_v62 = vpop.permute.xlu1 %324 }
 0x118   :  { %928 = vst [vmem:[%s3410_s2 + $0x498] sm:$0xff] %v592_v13  ;;  %v2713_v13 = vld [vmem:[%s3409_s1 + $0x68] sm:$0xff]  ;;  %vm423_vm13 = vcmp.eq.s32.totalorder %v325_v62, 1 }
 0x119   :  { %929 = vst [vmem:[%s3410_s2 + $0x4a0] sm:$0xff] %v593_v14  ;;  %v710_v14 = vsel %vm433_vm12, %v2713_v13, 0.0  ;;  %v650_v31 = vsel %vm423_vm13, %v1890_v0, 0.0  ;;  %v654_v0 = vsel %vm423_vm13, %v1928_v3, 0.0  ;;  %v2783_v3 = vld [vmem:[%s3409_s1 + $0xf8] sm:$0xff] }
 0x11a   :  { %930 = vst [vmem:[%s3410_s2 + $0x4a8] sm:$0xff] %v594_v15  ;;  %v711_v15 = vsel %vm433_vm12, %v1568_v26, 0.0  ;;  %v649_v26 = vsel %vm423_vm13, %v1880_v47, 0.0  ;;  %v653_v47 = vsel %vm423_vm13, %v1918_v1, 0.0 }
 0x11b   :  { %1009 = vst [vmem:[%s3410_s2 + $0x720] sm:$0xff] %v673_v16  ;;  %v712_v16 = vsel %vm433_vm12, %v1576_v27, 0.0  ;;  %v322_v27 = vpop.permute.xlu0 %321 }
 0x11c   :  { %1010 = vst [vmem:[%s3410_s2 + $0x728] sm:$0xff] %v674_v19  ;;  %v714_v19 = vsel %vm433_vm12, %v1605_v41, 0.0  ;;  %v651_v41 = vsel %vm423_vm13, %v1900_v58, 0.0  ;;  %vm422_vm14 = vcmp.eq.s32.totalorder %v322_v27, 1  ;;  %v2773_v58 = vld [vmem:[%s3409_s1 + $0xf0] sm:$0xff]  ;;  %v364_v1 = vpop.permute.xlu2 %363 }
 0x11d   :  { %1011 = vst [vmem:[%s3410_s2 + $0x730] sm:$0xff] %v675_v2  ;;  %v652_v2 = vsel %vm423_vm13, %v1908_v59, 0.0  ;;  %v643_v59 = vsel %vm422_vm14, %v2773_v58, 0.0  ;;  %vm436_vm15 = vcmp.eq.s32.totalorder %v364_v1, 1 }
 0x11e   :  { %1012 = vst [vmem:[%s3410_s2 + $0x738] sm:$0xff] %v676_v51  ;;  %v644_v51 = vsel %vm422_vm14, %v2783_v3, 0.0  ;;  %v728_v55 = vsel %vm436_vm15, %v2783_v3, 0.0 }
 0x11f   :  { %1013 = vst [vmem:[%s3410_s2 + $0x740] sm:$0xff] %v677_v52  ;;  %v2793_v52 = vld [vmem:[%s3409_s1 + $0x100] sm:$0xff] }
 0x120   :  { %1014 = vst [vmem:[%s3410_s2 + $0x748] sm:$0xff] %v678_v53  ;;  %v645_v53 = vsel %vm422_vm14, %v2793_v52, 0.0 }
 0x121   :  { %949 = vst [vmem:[%s3410_s2 + $0x540] sm:$0xff] %v613_v54  ;;  %v2800_v54 = vld [vmem:[%s3409_s1 + $0x108] sm:$0xff] }
 0x122   :  { %950 = vst [vmem:[%s3410_s2 + $0x548] sm:$0xff] %v614_v57  ;;  %v646_v56 = vsel %vm422_vm14, %v2800_v54, 0.0  ;;  %v2810_v57 = vld [vmem:[%s3409_s1 + $0x110] sm:$0xff] }
 0x123   :  { %951 = vst [vmem:[%s3410_s2 + $0x550] sm:$0xff] %v615_v4  ;;  %v647_v4 = vsel %vm422_vm14, %v2810_v57, 0.0 }
 0x124   :  { %952 = vst [vmem:[%s3410_s2 + $0x558] sm:$0xff] %v616_v5  ;;  %v2820_v5 = vld [vmem:[%s3409_s1 + $0x118] sm:$0xff] }
 0x125   :  { %953 = vst [vmem:[%s3410_s2 + $0x560] sm:$0xff] %v617_v44  ;;  %v648_v44 = vsel %vm422_vm14, %v2820_v5, 0.0 }
 0x126   :  { %954 = vst [vmem:[%s3410_s2 + $0x568] sm:$0xff] %v618_v46  ;;  %v727_v46 = vsel %vm436_vm15, %v2773_v58, 0.0 }
 0x127   :  { %943 = vst [vmem:[%s3410_s2 + $0x510] sm:$0xff] %v607_v48  ;;  %v334_v48 = vpop.permute.xlu1 %333 }
 0x128   :  { %944 = vst [vmem:[%s3410_s2 + $0x518] sm:$0xff] %v608_v61  ;;  %v729_v61 = vsel %vm436_vm15, %v2793_v52, 0.0  ;;  %vm426_vm0 = vcmp.eq.s32.totalorder %v334_v48, 1 }
 0x129   :  { %945 = vst [vmem:[%s3410_s2 + $0x520] sm:$0xff] %v609_v63  ;;  %v730_v63 = vsel %vm436_vm15, %v2800_v54, 0.0  ;;  %v668_v11 = vsel %vm426_vm0, %v2713_v13, 0.0 }
 0x12a   :  { %946 = vst [vmem:[%s3410_s2 + $0x528] sm:$0xff] %v610_v6  ;;  %v731_v6 = vsel %vm436_vm15, %v2810_v57, 0.0 }
 0x12b   :  { %947 = vst [vmem:[%s3410_s2 + $0x530] sm:$0xff] %v611_v7  ;;  %v732_v7 = vsel %vm436_vm15, %v2820_v5, 0.0 }
 0x12c   :  { %948 = vst [vmem:[%s3410_s2 + $0x538] sm:$0xff] %v612_v8  ;;  %v667_v8 = vsel %vm426_vm0, %v2703_v50, 0.0 }
 0x12d   :  { %1027 = vst [vmem:[%s3410_s2 + $0x7b0] sm:$0xff] %v691_v9  ;;  %v331_v9 = vpop.permute.xlu0 %330 }
 0x12e   :  { %1028 = vst [vmem:[%s3410_s2 + $0x7b8] sm:$0xff] %v692_v20  ;;  %v2873_v20 = vld [vmem:[%s3409_s1 + $0x70] sm:$0xff]  ;;  %vm425_vm1 = vcmp.eq.s32.totalorder %v331_v9, 1 }
 0x12f   :  { %1029 = vst [vmem:[%s3410_s2 + $0x7c0] sm:$0xff] %v693_v24  ;;  %v669_v24 = vsel %vm426_vm0, %v2873_v20, 0.0 }
 0x130   :  { %1030 = vst [vmem:[%s3410_s2 + $0x7c8] sm:$0xff] %v694_v25  ;;  %v2880_v25 = vld [vmem:[%s3409_s1 + $0x78] sm:$0xff] }
 0x131   :  { %1031 = vst [vmem:[%s3410_s2 + $0x7d0] sm:$0xff] %v695_v29  ;;  %v670_v29 = vsel %vm426_vm0, %v2880_v25, 0.0 }
 0x132   :  { %1032 = vst [vmem:[%s3410_s2 + $0x7d8] sm:$0xff] %v696_v30  ;;  %v2890_v30 = vld [vmem:[%s3409_s1 + $0x80] sm:$0xff] }
 0x133   :  { %967 = vst [vmem:[%s3410_s2 + $0x5d0] sm:$0xff] %v631_v33  ;;  %v671_v33 = vsel %vm426_vm0, %v2890_v30, 0.0 }
 0x134   :  { %968 = vst [vmem:[%s3410_s2 + $0x5d8] sm:$0xff] %v632_v38  ;;  %v672_v38 = vsel %vm426_vm0, %v2900_v35, 0.0 }
 0x135   :  { %969 = vst [vmem:[%s3410_s2 + $0x5e0] sm:$0xff] %v633_v42  ;;  %v2913_v42 = vld [vmem:[%s3409_s1 + $0x30] sm:$0xff] }
 0x136   :  { %970 = vst [vmem:[%s3410_s2 + $0x5e8] sm:$0xff] %v634_v45  ;;  %v661_v45 = vsel %vm425_vm1, %v2913_v42, 0.0 }
 0x137   :  { %971 = vst [vmem:[%s3410_s2 + $0x5f0] sm:$0xff] %v635_v10  ;;  %v373_v10 = vpop.permute.xlu2 %372 }
 0x138   :  { %972 = vst [vmem:[%s3410_s2 + $0x5f8] sm:$0xff] %v636_v12  ;;  %v2923_v12 = vld [vmem:[%s3409_s1 + $0x38] sm:$0xff]  ;;  %vm439_vm2 = vcmp.eq.s32.totalorder %v373_v10, 1  ;;  %v1149_v10 = vld [vmem:[%s3409_s1] sm:$0xff] }
 0x139   :  { %961 = vst [vmem:[%s3410_s2 + $0x5a0] sm:$0xff] %v625_v21  ;;  %v662_v21 = vsel %vm425_vm1, %v2923_v12, 0.0 }
 0x13a   :  { %962 = vst [vmem:[%s3410_s2 + $0x5a8] sm:$0xff] %v626_v36  ;;  %v663_v36 = vsel %vm425_vm1, %v2933_v22, 0.0 }
 0x13b   :  { %963 = vst [vmem:[%s3410_s2 + $0x5b0] sm:$0xff] %v627_v40  ;;  %v2940_v40 = vld [vmem:[%s3409_s1 + $0x48] sm:$0xff] }
 0x13c   :  { %964 = vst [vmem:[%s3410_s2 + $0x5b8] sm:$0xff] %v628_v49  ;;  %v664_v49 = vsel %vm425_vm1, %v2940_v40, 0.0 }
 0x13d   :  { %965 = vst [vmem:[%s3410_s2 + $0x5c0] sm:$0xff] %v629_v17  ;;  %v2950_v17 = vld [vmem:[%s3409_s1 + $0x50] sm:$0xff] }
 0x13e   :  { %966 = vst [vmem:[%s3410_s2 + $0x5c8] sm:$0xff] %v630_v23  ;;  %v665_v23 = vsel %vm425_vm1, %v2950_v17, 0.0 }
 0x13f   :  { %1045 = vst [vmem:[%s3410_s2 + $0x840] sm:$0xff] %v709_v60  ;;  %v2960_v60 = vld [vmem:[%s3409_s1 + $0x58] sm:$0xff] }
 0x140   :  { %1046 = vst [vmem:[%s3410_s2 + $0x848] sm:$0xff] %v710_v14  ;;  %v666_v62 = vsel %vm425_vm1, %v2960_v60, 0.0  ;;  %v745_v14 = vsel %vm439_vm2, %v2913_v42, 0.0  ;;  %v750_v27 = vsel %vm439_vm2, %v2960_v60, 0.0 }
 0x141   :  { %1047 = vst [vmem:[%s3410_s2 + $0x850] sm:$0xff] %v711_v15  ;;  %v343_v15 = vpop.permute.xlu1 %342 }
 0x142   :  { %1048 = vst [vmem:[%s3410_s2 + $0x858] sm:$0xff] %v712_v16  ;;  %v746_v16 = vsel %vm439_vm2, %v2923_v12, 0.0  ;;  %vm429_vm3 = vcmp.eq.s32.totalorder %v343_v15, 1 }
 0x143   :  { %1049 = vst [vmem:[%s3410_s2 + $0x860] sm:$0xff] %v713_v18  ;;  %v747_v18 = vsel %vm439_vm2, %v2933_v22, 0.0  ;;  %v690_v1 = vsel %vm429_vm3, %v2820_v5, 0.0 }
 0x144   :  { %1050 = vst [vmem:[%s3410_s2 + $0x868] sm:$0xff] %v714_v19  ;;  %v748_v19 = vsel %vm439_vm2, %v2940_v40, 0.0 }
 0x145   :  { %985 = vst [vmem:[%s3410_s2 + $0x660] sm:$0xff] %v649_v26  ;;  %v749_v26 = vsel %vm439_vm2, %v2950_v17, 0.0 }
 0x146   :  { %986 = vst [vmem:[%s3410_s2 + $0x668] sm:$0xff] %v650_v31  ;;  %v685_v31 = vsel %vm429_vm3, %v2773_v58, 0.0 }
 0x147   :  { %987 = vst [vmem:[%s3410_s2 + $0x670] sm:$0xff] %v651_v41  ;;  %v340_v41 = vpop.permute.xlu0 %339 }
 0x148   :  { %988 = vst [vmem:[%s3410_s2 + $0x678] sm:$0xff] %v652_v2  ;;  %v686_v2 = vsel %vm429_vm3, %v2783_v3, 0.0  ;;  %vm428_vm4 = vcmp.eq.s32.totalorder %v340_v41, 1  ;;  %v1157_v41 = vld [vmem:[%s3409_s1 + $0xa0] sm:$0xff] }
 0x149   :  { %989 = vst [vmem:[%s3410_s2 + $0x680] sm:$0xff] %v653_v47  ;;  %v687_v47 = vsel %vm429_vm3, %v2793_v52, 0.0  ;;  %v684_v48 = vsel %vm428_vm4, %v2480_v43, 0.0 }
 0x14a   :  { %990 = vst [vmem:[%s3410_s2 + $0x688] sm:$0xff] %v654_v0  ;;  %v688_v0 = vsel %vm429_vm3, %v2800_v54, 0.0 }
 0x14b   :  { %979 = vst [vmem:[%s3410_s2 + $0x630] sm:$0xff] %v643_v59  ;;  %v689_v59 = vsel %vm429_vm3, %v2810_v57, 0.0 }
 0x14c   :  { %980 = vst [vmem:[%s3410_s2 + $0x638] sm:$0xff] %v644_v51  ;;  %v679_v51 = vsel %vm428_vm4, %v2433_v28, 0.0 }
 0x14d   :  { %981 = vst [vmem:[%s3410_s2 + $0x640] sm:$0xff] %v645_v53  ;;  %v382_v53 = vpop.permute.xlu2 %381 }
 0x14e   :  { %982 = vst [vmem:[%s3410_s2 + $0x648] sm:$0xff] %v646_v56  ;;  %v680_v56 = vsel %vm428_vm4, %v2443_v32, 0.0  ;;  %vm442_vm5 = vcmp.eq.s32.totalorder %v382_v53, 1 }
 0x14f   :  { %983 = vst [vmem:[%s3410_s2 + $0x650] sm:$0xff] %v647_v4  ;;  %v681_v4 = vsel %vm428_vm4, %v2453_v34, 0.0  ;;  %v768_v9 = vsel %vm442_vm5, %v2480_v43, 0.0 }
 0x150   :  { %984 = vst [vmem:[%s3410_s2 + $0x658] sm:$0xff] %v648_v44  ;;  %v682_v44 = vsel %vm428_vm4, %v2460_v37, 0.0 }
 0x151   :  { %1063 = vst [vmem:[%s3410_s2 + $0x8d0] sm:$0xff] %v727_v46  ;;  %v683_v46 = vsel %vm428_vm4, %v2470_v39, 0.0 }
 0x152   :  { %1064 = vst [vmem:[%s3410_s2 + $0x8d8] sm:$0xff] %v728_v55  ;;  %v763_v55 = vsel %vm442_vm5, %v2433_v28, 0.0 }
 0x153   :  { %1065 = vst [vmem:[%s3410_s2 + $0x8e0] sm:$0xff] %v729_v61  ;;  %v352_v61 = vpop.permute.xlu1 %351 }
 0x154   :  { %1066 = vst [vmem:[%s3410_s2 + $0x8e8] sm:$0xff] %v730_v63  ;;  %v764_v63 = vsel %vm442_vm5, %v2443_v32, 0.0  ;;  %vm432_vm6 = vcmp.eq.s32.totalorder %v352_v61, 1 }
 0x155   :  { %1067 = vst [vmem:[%s3410_s2 + $0x8f0] sm:$0xff] %v731_v6  ;;  %v765_v6 = vsel %vm442_vm5, %v2453_v34, 0.0 }
 0x156   :  { %1068 = vst [vmem:[%s3410_s2 + $0x8f8] sm:$0xff] %v732_v7  ;;  %v766_v7 = vsel %vm442_vm5, %v2460_v37, 0.0 }
 0x157   :  { %1003 = vst [vmem:[%s3410_s2 + $0x6f0] sm:$0xff] %v667_v8  ;;  %v767_v8 = vsel %vm442_vm5, %v2470_v39, 0.0 }
 0x158   :  { %1004 = vst [vmem:[%s3410_s2 + $0x6f8] sm:$0xff] %v668_v11  ;;  %v703_v11 = vsel %vm432_vm6, %v2913_v42, 0.0  ;;  %v707_v42 = vsel %vm432_vm6, %v2950_v17, 0.0  ;;  %v1152_v17 = vld [vmem:[%s3409_s1 + $0x18] sm:$0xff] }
 0x159   :  { %1005 = vst [vmem:[%s3410_s2 + $0x700] sm:$0xff] %v669_v24  ;;  %v349_v24 = vpop.permute.xlu0 %348 }
 0x15a   :  { %1006 = vst [vmem:[%s3410_s2 + $0x708] sm:$0xff] %v670_v29  ;;  %v704_v29 = vsel %vm432_vm6, %v2923_v12, 0.0  ;;  %vm431_vm7 = vcmp.eq.s32.totalorder %v349_v24, 1 }
 0x15b   :  { %1007 = vst [vmem:[%s3410_s2 + $0x710] sm:$0xff] %v671_v33  ;;  %v705_v33 = vsel %vm432_vm6, %v2933_v22, 0.0  ;;  %v697_v12 = vsel %vm431_vm7, %v1149_v10, 0.0  ;;  %v1150_v22 = vld [vmem:[%s3409_s1 + $0x8] sm:$0xff] }
 0x15c   :  { %1008 = vst [vmem:[%s3410_s2 + $0x718] sm:$0xff] %v672_v38  ;;  %v706_v38 = vsel %vm432_vm6, %v2940_v40, 0.0  ;;  %v1151_v40 = vld [vmem:[%s3409_s1 + $0x10] sm:$0xff] }
 0x15d   :  { %997 = vst [vmem:[%s3410_s2 + $0x6c0] sm:$0xff] %v661_v45  ;;  %v708_v45 = vsel %vm432_vm6, %v2960_v60, 0.0  ;;  %v1153_v60 = vld [vmem:[%s3409_s1 + $0x20] sm:$0xff] }
 0x15e   :  { %998 = vst [vmem:[%s3410_s2 + $0x6c8] sm:$0xff] %v662_v21  ;;  %v361_v21 = vpop.permute.xlu1 %360 }
 0x15f   :  { %999 = vst [vmem:[%s3410_s2 + $0x6d0] sm:$0xff] %v663_v36  ;;  %v698_v36 = vsel %vm431_vm7, %v1150_v22, 0.0  ;;  %vm435_vm8 = vcmp.eq.s32.totalorder %v361_v21, 1 }
 0x160   :  { %1000 = vst [vmem:[%s3410_s2 + $0x6d8] sm:$0xff] %v664_v49  ;;  %v699_v49 = vsel %vm431_vm7, %v1151_v40, 0.0 }
 0x161   :  { %1001 = vst [vmem:[%s3410_s2 + $0x6e0] sm:$0xff] %v665_v23  ;;  %v700_v23 = vsel %vm431_vm7, %v1152_v17, 0.0 }
 0x162   :  { %1002 = vst [vmem:[%s3410_s2 + $0x6e8] sm:$0xff] %v666_v62  ;;  %v701_v62 = vsel %vm431_vm7, %v1153_v60, 0.0 }
 0x163   :  { %1081 = vst [vmem:[%s3410_s2 + $0x960] sm:$0xff] %v745_v14  ;;  %v1154_v14 = vld [vmem:[%s3409_s1 + $0x28] sm:$0xff] }
 0x164   :  { %1082 = vst [vmem:[%s3410_s2 + $0x968] sm:$0xff] %v746_v16  ;;  %v702_v15 = vsel %vm431_vm7, %v1154_v14, 0.0  ;;  %v721_v16 = vsel %vm435_vm8, %v2433_v28, 0.0  ;;  %v725_v28 = vsel %vm435_vm8, %v2470_v39, 0.0 }
 0x165   :  { %1083 = vst [vmem:[%s3410_s2 + $0x970] sm:$0xff] %v747_v18  ;;  %v358_v18 = vpop.permute.xlu0 %357 }
 0x166   :  { %1084 = vst [vmem:[%s3410_s2 + $0x978] sm:$0xff] %v748_v19  ;;  %v722_v19 = vsel %vm435_vm8, %v2443_v32, 0.0  ;;  %vm434_vm9 = vcmp.eq.s32.totalorder %v358_v18, 1  ;;  %v726_v32 = vsel %vm435_vm8, %v2480_v43, 0.0  ;;  %v370_v39 = vpop.permute.xlu1 %369  ;;  %v1156_v43 = vld [vmem:[%s3409_s1 + $0x98] sm:$0xff] }
 0x167   :  { %1085 = vst [vmem:[%s3410_s2 + $0x980] sm:$0xff] %v749_v26  ;;  %v723_v26 = vsel %vm435_vm8, %v2453_v34, 0.0  ;;  %v1155_v34 = vld [vmem:[%s3409_s1 + $0x90] sm:$0xff]  ;;  %vm438_vm10 = vcmp.eq.s32.totalorder %v370_v39, 1 }
 0x168   :  { %1086 = vst [vmem:[%s3410_s2 + $0x988] sm:$0xff] %v750_v27  ;;  %v724_v27 = vsel %vm435_vm8, %v2460_v37, 0.0  ;;  %v715_v37 = vsel %vm434_vm9, %v1155_v34, 0.0  ;;  %v744_v61 = vsel %vm438_vm10, %v1154_v14, 0.0 }
 0x169   :  { %1021 = vst [vmem:[%s3410_s2 + $0x780] sm:$0xff] %v685_v31  ;;  %v716_v31 = vsel %vm434_vm9, %v1156_v43, 0.0 }
 0x16a   :  { %1022 = vst [vmem:[%s3410_s2 + $0x788] sm:$0xff] %v686_v2  ;;  %v717_v2 = vsel %vm434_vm9, %v1157_v41, 0.0 }
 0x16b   :  { %1023 = vst [vmem:[%s3410_s2 + $0x790] sm:$0xff] %v687_v47  ;;  %v1158_v47 = vld [vmem:[%s3409_s1 + $0xa8] sm:$0xff] }
 0x16c   :  { %1024 = vst [vmem:[%s3410_s2 + $0x798] sm:$0xff] %v688_v0  ;;  %v718_v0 = vsel %vm434_vm9, %v1158_v47, 0.0 }
 0x16d   :  { %1025 = vst [vmem:[%s3410_s2 + $0x7a0] sm:$0xff] %v689_v59  ;;  %v1159_v59 = vld [vmem:[%s3409_s1 + $0xb0] sm:$0xff] }
 0x16e   :  { %1026 = vst [vmem:[%s3410_s2 + $0x7a8] sm:$0xff] %v690_v1  ;;  %v719_v1 = vsel %vm434_vm9, %v1159_v59, 0.0 }
 0x16f   :  { %1015 = vst [vmem:[%s3410_s2 + $0x750] sm:$0xff] %v679_v51  ;;  %v1160_v51 = vld [vmem:[%s3409_s1 + $0xb8] sm:$0xff] }
 0x170   :  { %1016 = vst [vmem:[%s3410_s2 + $0x758] sm:$0xff] %v680_v56  ;;  %v720_v53 = vsel %vm434_vm9, %v1160_v51, 0.0  ;;  %v739_v56 = vsel %vm438_vm10, %v1149_v10, 0.0 }
 0x171   :  { %1017 = vst [vmem:[%s3410_s2 + $0x760] sm:$0xff] %v681_v4  ;;  %v367_v4 = vpop.permute.xlu0 %366 }
 0x172   :  { %1018 = vst [vmem:[%s3410_s2 + $0x768] sm:$0xff] %v682_v44  ;;  %v740_v44 = vsel %vm438_vm10, %v1150_v22, 0.0  ;;  %vm437_vm11 = vcmp.eq.s32.totalorder %v367_v4, 1 }
 0x173   :  { %1019 = vst [vmem:[%s3410_s2 + $0x770] sm:$0xff] %v683_v46  ;;  %v741_v46 = vsel %vm438_vm10, %v1151_v40, 0.0 }
 0x174   :  { %1020 = vst [vmem:[%s3410_s2 + $0x778] sm:$0xff] %v684_v48  ;;  %v742_v48 = vsel %vm438_vm10, %v1152_v17, 0.0 }
 0x175   :  { %1099 = vst [vmem:[%s3410_s2 + $0x9f0] sm:$0xff] %v763_v55  ;;  %v743_v55 = vsel %vm438_vm10, %v1153_v60, 0.0 }
 0x176   :  { %1100 = vst [vmem:[%s3410_s2 + $0x9f8] sm:$0xff] %v764_v63  ;;  %v1161_v63 = vld [vmem:[%s3409_s1 + $0x120] sm:$0xff] }
 0x177   :  { %1101 = vst [vmem:[%s3410_s2 + $0xa00] sm:$0xff] %v765_v6  ;;  %v733_v6 = vsel %vm437_vm11, %v1161_v63, 0.0 }
 0x178   :  { %1102 = vst [vmem:[%s3410_s2 + $0xa08] sm:$0xff] %v766_v7  ;;  %v379_v7 = vpop.permute.xlu1 %378 }
 0x179   :  { %1103 = vst [vmem:[%s3410_s2 + $0xa10] sm:$0xff] %v767_v8  ;;  %v1162_v8 = vld [vmem:[%s3409_s1 + $0x128] sm:$0xff]  ;;  %vm441_vm12 = vcmp.eq.s32.totalorder %v379_v7, 1  ;;  %v376_v21 = vpop.permute.xlu0 %375 }
 0x17a   :  { %1104 = vst [vmem:[%s3410_s2 + $0xa18] sm:$0xff] %v768_v9  ;;  %v734_v9 = vsel %vm437_vm11, %v1162_v8, 0.0  ;;  %v758_v22 = vsel %vm441_vm12, %v1156_v43, 0.0  ;;  %v760_v40 = vsel %vm441_vm12, %v1158_v47, 0.0  ;;  %vm440_vm13 = vcmp.eq.s32.totalorder %v376_v21, 1 }
 0x17b   :  { %1039 = vst [vmem:[%s3410_s2 + $0x810] sm:$0xff] %v703_v11  ;;  %v1163_v11 = vld [vmem:[%s3409_s1 + $0x130] sm:$0xff]  ;;  %v762_v17 = vsel %vm441_vm12, %v1160_v51, 0.0  ;;  %v753_v14 = vsel %vm440_vm13, %v2873_v20, 0.0 }
 0x17c   :  { %1040 = vst [vmem:[%s3410_s2 + $0x818] sm:$0xff] %v704_v29  ;;  %v735_v24 = vsel %vm437_vm11, %v1163_v11, 0.0  ;;  %v1164_v29 = vld [vmem:[%s3409_s1 + $0x138] sm:$0xff] }
 0x17d   :  { %1041 = vst [vmem:[%s3410_s2 + $0x820] sm:$0xff] %v705_v33  ;;  %v736_v33 = vsel %vm437_vm11, %v1164_v29, 0.0 }
 0x17e   :  { %1042 = vst [vmem:[%s3410_s2 + $0x828] sm:$0xff] %v706_v38  ;;  %v1165_v38 = vld [vmem:[%s3409_s1 + $0x140] sm:$0xff] }
 0x17f   :  { %1043 = vst [vmem:[%s3410_s2 + $0x830] sm:$0xff] %v707_v42  ;;  %v737_v42 = vsel %vm437_vm11, %v1165_v38, 0.0 }
 0x180   :  { %1044 = vst [vmem:[%s3410_s2 + $0x838] sm:$0xff] %v708_v45  ;;  %v1166_v45 = vld [vmem:[%s3409_s1 + $0x148] sm:$0xff]  ;;  %v388_v60 = vpop.permute.xlu1 %387 }
 0x181   :  { %1033 = vst [vmem:[%s3410_s2 + $0x7e0] sm:$0xff] %v697_v12  ;;  %v738_v10 = vsel %vm437_vm11, %v1166_v45, 0.0  ;;  %v757_v12 = vsel %vm441_vm12, %v1155_v34, 0.0  ;;  %vm444_vm14 = vcmp.eq.s32.totalorder %v388_v60, 1 }
 0x182   :  { %1034 = vst [vmem:[%s3410_s2 + $0x7e8] sm:$0xff] %v698_v36  ;;  %v759_v36 = vsel %vm441_vm12, %v1157_v41, 0.0  ;;  %v775_v20 = vsel %vm444_vm14, %v1161_v63, 0.0  ;;  %v779_v18 = vsel %vm444_vm14, %v1165_v38, 0.0 }
 0x183   :  { %1035 = vst [vmem:[%s3410_s2 + $0x7f0] sm:$0xff] %v699_v49  ;;  %v761_v49 = vsel %vm441_vm12, %v1159_v59, 0.0 }
 0x184   :  { %1036 = vst [vmem:[%s3410_s2 + $0x7f8] sm:$0xff] %v700_v23  ;;  %v751_v23 = vsel %vm440_vm13, %v2703_v50, 0.0  ;;  %v755_v50 = vsel %vm440_vm13, %v2890_v30, 0.0  ;;  %v776_v30 = vsel %vm444_vm14, %v1162_v8, 0.0 }
 0x185   :  { %1037 = vst [vmem:[%s3410_s2 + $0x800] sm:$0xff] %v701_v62  ;;  %v752_v62 = vsel %vm440_vm13, %v2713_v13, 0.0  ;;  %v756_v13 = vsel %vm440_vm13, %v2900_v35, 0.0  ;;  %v777_v35 = vsel %vm444_vm14, %v1163_v11, 0.0 }
 0x186   :  { %1038 = vst [vmem:[%s3410_s2 + $0x808] sm:$0xff] %v702_v15  ;;  %v754_v15 = vsel %vm440_vm13, %v2880_v25, 0.0  ;;  %v385_v25 = vpop.permute.xlu0 %384 }
 0x187   :  { %1057 = vst [vmem:[%s3410_s2 + $0x8a0] sm:$0xff] %v721_v16  ;;  %v778_v16 = vsel %vm444_vm14, %v1164_v29, 0.0  ;;  %vm443_vm15 = vcmp.eq.s32.totalorder %v385_v25, 1 }
 0x188   :  { %1058 = vst [vmem:[%s3410_s2 + $0x8a8] sm:$0xff] %v722_v19  ;;  %v780_v19 = vsel %vm444_vm14, %v1166_v45, 0.0 }
 0x189   :  { %1059 = vst [vmem:[%s3410_s2 + $0x8b0] sm:$0xff] %v723_v26  ;;  %v769_v26 = vsel %vm443_vm15, %v2773_v58, 0.0  ;;  %v773_v58 = vsel %vm443_vm15, %v2810_v57, 0.0 }
 0x18a   :  { %1060 = vst [vmem:[%s3410_s2 + $0x8b8] sm:$0xff] %v724_v27  ;;  %v770_v27 = vsel %vm443_vm15, %v2783_v3, 0.0  ;;  %v774_v3 = vsel %vm443_vm15, %v2820_v5, 0.0 }
 0x18b   :  { %1061 = vst [vmem:[%s3410_s2 + $0x8c0] sm:$0xff] %v725_v28  ;;  %v771_v28 = vsel %vm443_vm15, %v2793_v52, 0.0 }
 0x18c   :  { %1062 = vst [vmem:[%s3410_s2 + $0x8c8] sm:$0xff] %v726_v32  ;;  %v772_v32 = vsel %vm443_vm15, %v2800_v54, 0.0 }
 0x18d   :  { %1051 = vst [vmem:[%s3410_s2 + $0x870] sm:$0xff] %v715_v37 }
 0x18e   :  { %1052 = vst [vmem:[%s3410_s2 + $0x878] sm:$0xff] %v716_v31 }
 0x18f   :  { %1053 = vst [vmem:[%s3410_s2 + $0x880] sm:$0xff] %v717_v2 }
 0x190   :  { %1054 = vst [vmem:[%s3410_s2 + $0x888] sm:$0xff] %v718_v0 }
 0x191   :  { %1055 = vst [vmem:[%s3410_s2 + $0x890] sm:$0xff] %v719_v1 }
 0x192   :  { %1056 = vst [vmem:[%s3410_s2 + $0x898] sm:$0xff] %v720_v53 }
 0x193   :  { %1075 = vst [vmem:[%s3410_s2 + $0x930] sm:$0xff] %v739_v56 }
 0x194   :  { %1076 = vst [vmem:[%s3410_s2 + $0x938] sm:$0xff] %v740_v44 }
 0x195   :  { %1077 = vst [vmem:[%s3410_s2 + $0x940] sm:$0xff] %v741_v46 }
 0x196   :  { %1078 = vst [vmem:[%s3410_s2 + $0x948] sm:$0xff] %v742_v48 }
 0x197   :  { %1079 = vst [vmem:[%s3410_s2 + $0x950] sm:$0xff] %v743_v55 }
 0x198   :  { %1080 = vst [vmem:[%s3410_s2 + $0x958] sm:$0xff] %v744_v61 }
 0x199   :  { %1069 = vst [vmem:[%s3410_s2 + $0x900] sm:$0xff] %v733_v6 }
 0x19a   :  { %1070 = vst [vmem:[%s3410_s2 + $0x908] sm:$0xff] %v734_v9 }
 0x19b   :  { %1071 = vst [vmem:[%s3410_s2 + $0x910] sm:$0xff] %v735_v24 }
 0x19c   :  { %1072 = vst [vmem:[%s3410_s2 + $0x918] sm:$0xff] %v736_v33 }
 0x19d   :  { %1073 = vst [vmem:[%s3410_s2 + $0x920] sm:$0xff] %v737_v42 }
 0x19e   :  { %1074 = vst [vmem:[%s3410_s2 + $0x928] sm:$0xff] %v738_v10 }
 0x19f   :  { %1093 = vst [vmem:[%s3410_s2 + $0x9c0] sm:$0xff] %v757_v12 }
 0x1a0   :  { %1094 = vst [vmem:[%s3410_s2 + $0x9c8] sm:$0xff] %v758_v22 }
 0x1a1   :  { %1095 = vst [vmem:[%s3410_s2 + $0x9d0] sm:$0xff] %v759_v36 }
 0x1a2   :  { %1096 = vst [vmem:[%s3410_s2 + $0x9d8] sm:$0xff] %v760_v40 }
 0x1a3   :  { %1097 = vst [vmem:[%s3410_s2 + $0x9e0] sm:$0xff] %v761_v49 }
 0x1a4   :  { %1098 = vst [vmem:[%s3410_s2 + $0x9e8] sm:$0xff] %v762_v17 }
 0x1a5   :  { %1087 = vst [vmem:[%s3410_s2 + $0x990] sm:$0xff] %v751_v23 }
 0x1a6   :  { %1088 = vst [vmem:[%s3410_s2 + $0x998] sm:$0xff] %v752_v62 }
 0x1a7   :  { %1089 = vst [vmem:[%s3410_s2 + $0x9a0] sm:$0xff] %v753_v14 }
 0x1a8   :  { %1090 = vst [vmem:[%s3410_s2 + $0x9a8] sm:$0xff] %v754_v15 }
 0x1a9   :  { %1091 = vst [vmem:[%s3410_s2 + $0x9b0] sm:$0xff] %v755_v50 }
 0x1aa   :  { %1092 = vst [vmem:[%s3410_s2 + $0x9b8] sm:$0xff] %v756_v13 }
 0x1ab   :  { %1111 = vst [vmem:[%s3410_s2 + $0xa50] sm:$0xff] %v775_v20 }
 0x1ac   :  { %1112 = vst [vmem:[%s3410_s2 + $0xa58] sm:$0xff] %v776_v30 }
 0x1ad   :  { %1113 = vst [vmem:[%s3410_s2 + $0xa60] sm:$0xff] %v777_v35 }
 0x1ae   :  { %1114 = vst [vmem:[%s3410_s2 + $0xa68] sm:$0xff] %v778_v16 }
 0x1af   :  { %1115 = vst [vmem:[%s3410_s2 + $0xa70] sm:$0xff] %v779_v18 }
 0x1b0   :  { %1116 = vst [vmem:[%s3410_s2 + $0xa78] sm:$0xff] %v780_v19 }
 0x1b1   :  { %1105 = vst [vmem:[%s3410_s2 + $0xa20] sm:$0xff] %v769_v26 }
 0x1b2   :  { %1106 = vst [vmem:[%s3410_s2 + $0xa28] sm:$0xff] %v770_v27 }
 0x1b3   :  { %1107 = vst [vmem:[%s3410_s2 + $0xa30] sm:$0xff] %v771_v28 }
 0x1b4   :  { %1108 = vst [vmem:[%s3410_s2 + $0xa38] sm:$0xff] %v772_v32 }
 0x1b5   :  { %1109 = vst [vmem:[%s3410_s2 + $0xa40] sm:$0xff] %v773_v58 }
 0x1b6   :  { %1110 = vst [vmem:[%s3410_s2 + $0xa48] sm:$0xff] %v774_v3 }

</bundles_post_ra>
